<compile_context>
chip_gen: v7x
topology: tpu7x:2x2x1
jax: 0.10.0
libtpu: 0.0.40
codegen_flags: <defaults>
</compile_context>

<pallas_src>
import functools

import numpy as np
import jax
import jax.numpy as jnp
from jax.experimental import pallas as pl
from jax.experimental.pallas import tpu as pltpu


# Architecture of ISSBA.py::Discriminator (in_channel -> 8 -> 16 -> 32 -> 64 -> 1).
_OUT_CHANNELS = (8, 16, 32, 64, 1)
_STRIDES = (2, 2, 2, 2, 1)
_KSIZE = 3
_PAD = 1        # Conv2dSame with k=3, dilation=1  ->  pad (1,1,1,1)
_BM = 8         # batch rows per grid step (sublane multiple)


def _conv_out_hw(h, w, stride):
    ho = (h + 2 * _PAD - _KSIZE) // stride + 1
    wo = (w + 2 * _PAD - _KSIZE) // stride + 1
    return ho, wo


# --------------------- weight lowering (one-time, wrapper) --------------------- #

def _dense_indices(h_in, w_in, cin, cout, stride, nchw_input):
    """Static scatter indices embedding a 3x3 'same' (zero-pad) strided conv into a
    dense (h_in*w_in*cin, ho*wo*cout) matrix acting on flattened activations."""
    ho, wo = _conv_out_hw(h_in, w_in, stride)
    OH, OW, KH, KW, CI, CO = np.meshgrid(
        np.arange(ho), np.arange(wo), np.arange(_KSIZE), np.arange(_KSIZE),
        np.arange(cin), np.arange(cout), indexing="ij")
    IH = OH * stride + KH - _PAD
    IW = OW * stride + KW - _PAD
    valid = (IH >= 0) & (IH < h_in) & (IW >= 0) & (IW < w_in)  # dropped rows == zero pad
    if nchw_input:                       # layer-1 input is the flattened NCHW image
        rows = (CI * h_in + IH) * w_in + IW
    else:                                # inter-layer activations are flat (h, w, c)
        rows = (IH * w_in + IW) * cin + CI
    cols = (OH * wo + OW) * cout + CO
    kidx = ((KH * _KSIZE + KW) * cin + CI) * cout + CO          # index into w_hwio.ravel()
    return rows[valid], cols[valid], kidx[valid], ho, wo


def lower_discriminator_weights(params, in_hw, in_channel=3):
    """One-time parameter preprocessing: lower every Conv2dSame layer to a dense matmul
    over flattened activations.  Pure function of the weights (tiny); cache/reuse it."""
    hh, ww = in_hw
    cin = in_channel
    nchw = True
    lowered = {}
    for li, (cout, stride) in enumerate(zip(_OUT_CHANNELS, _STRIDES), start=1):
        w_hwio = params[f"w{li}"].astype(jnp.float32)           # (3, 3, cin, cout)
        b = params[f"b{li}"].astype(jnp.float32)                # (cout,)
        rows, cols, kidx, ho, wo = _dense_indices(hh, ww, cin, cout, stride, nchw)
        dense = jnp.zeros((hh * ww * cin, ho * wo * cout), jnp.float32)
        dense = dense.at[rows, cols].set(w_hwio.reshape(-1)[kidx])
        lowered[f"w{li}"] = dense
        lowered[f"b{li}"] = jnp.tile(b, ho * wo).reshape(1, ho * wo * cout)
        hh, ww, cin, nchw = ho, wo, cout, False
    if lowered["w5"].shape[1] == 1:      # single output feature -> keep as a (1, K) row
        lowered["w5"] = lowered["w5"].T  # so the kernel can use a VPU reduce, not N=1 MXU
    return lowered


# ------------------------------ fused Pallas kernel ----------------------------- #

def _discriminator_kernel(x_ref, w1, b1, w2, b2, w3, b3, w4, b4, w5, b5,
                          o_ref, *, n_valid, inv_total, last_as_row):
    g = pl.program_id(0)

    # Fused `image - 0.5` (zero padding is already folded into the dense weights as
    # dropped rows, which matches PyTorch's pad-after-subtract ordering).
    x = x_ref[...] - 0.5

    def layer(a, w_ref, b_ref):
        z = jnp.dot(a, w_ref[...], preferred_element_type=jnp.float32) + b_ref[...]
        return jnp.maximum(z, 0.0)

    a = layer(x, w1, b1)
    a = layer(a, w2, b2)
    a = layer(a, w3, b3)
    a = layer(a, w4, b4)
    if last_as_row:   # C_out == 1: broadcast-multiply + lane reduce on the VPU
        z = jnp.sum(a * w5[...], axis=1, keepdims=True) + b5[...]
        a = jnp.maximum(z, 0.0)
    else:
        a = layer(a, w5, b5)

    # Mask batch-padding rows, reduce this block to a partial sum.
    row = g * a.shape[0] + jax.lax.broadcasted_iota(jnp.int32, a.shape, 0)
    masked = jnp.where(row < n_valid, a, 0.0)
    part = jnp.sum(jnp.sum(masked, axis=1, keepdims=True), axis=0, keepdims=True)  # (1,1)

    @pl.when(g == 0)
    def _init():
        o_ref[...] = jnp.zeros_like(o_ref)

    o_ref[...] = o_ref[...] + part

    @pl.when(g == pl.num_programs(0) - 1)
    def _finalize():
        o_ref[...] = o_ref[...] * inv_total          # running sum -> mean (once, at end)


def discriminator_forward(image_nchw, lowered):
    """Pallas implementation of Discriminator.forward. `image_nchw` is PyTorch-style NCHW;
    `lowered` comes from lower_discriminator_weights (same spatial size)."""
    n, cin, h, w = image_nchw.shape
    x = image_nchw.astype(jnp.float32).reshape(n, cin * h * w)   # flat NCHW rows

    n_pad = ((n + _BM - 1) // _BM) * _BM
    if n_pad != n:
        x = jnp.pad(x, ((0, n_pad - n), (0, 0)))
    grid = (n_pad // _BM,)

    # Static shape of the final conv output -> mean denominator.
    hh, ww = h, w
    for s in _STRIDES:
        hh, ww = _conv_out_hw(hh, ww, s)
    total = n * hh * ww * _OUT_CHANNELS[-1]

    last_as_row = lowered["w5"].shape[0] == 1
    kernel = functools.partial(_discriminator_kernel, n_valid=n,
                               inv_total=1.0 / total, last_as_row=last_as_row)

    def const_spec(arr):  # grid-invariant, whole array resident in VMEM
        return pl.BlockSpec(arr.shape, lambda g: (0, 0))

    weight_keys = ("w1", "b1", "w2", "b2", "w3", "b3", "w4", "b4", "w5", "b5")
    out = pl.pallas_call(
        kernel,
        out_shape=jax.ShapeDtypeStruct((1, 1), jnp.float32),
        grid=grid,
        in_specs=[pl.BlockSpec((_BM, x.shape[1]), lambda g: (g, 0))]
                 + [const_spec(lowered[k]) for k in weight_keys],
        out_specs=pl.BlockSpec((1, 1), lambda g: (0, 0)),
        compiler_params=pltpu.CompilerParams(
            dimension_semantics=("arbitrary",)),   # batch axis carries the accumulator
    )(x, *[lowered[k] for k in weight_keys])
    return out[0, 0]


# ----------------------------- reference / params ------------------------------ #

def _reference_forward(image_nchw, params):
    x = jnp.transpose(image_nchw, (0, 2, 3, 1)).astype(jnp.float32) - 0.5
    for li, s in zip(range(1, 6), _STRIDES):
        y = jax.lax.conv_general_dilated(
            x, params[f"w{li}"], (s, s), [(1, 1), (1, 1)],
            dimension_numbers=("NHWC", "HWIO", "NHWC"))
        x = jax.nn.relu(y + params[f"b{li}"])
    return jnp.mean(x)


def _init_params(key, in_channel=3):
    params = {}
    cin = in_channel
    for li, cout in enumerate(_OUT_CHANNELS, start=1):
        key, kw_, kb_ = jax.random.split(key, 3)
        fan_in = _KSIZE * _KSIZE * cin
        wgt = jax.random.normal(kw_, (_KSIZE, _KSIZE, cin, cout), jnp.float32) / np.sqrt(fan_in)
        if li == len(_OUT_CHANNELS):
            wgt = jnp.abs(wgt)   # keep the scalar test output away from the ReLU dead zone
        params[f"w{li}"] = wgt
        params[f"b{li}"] = jax.random.uniform(kb_, (cout,), jnp.float32, 0.01, 0.05)
        cin = cout
    return params


# ------------------------------------- main ------------------------------------- #

if __name__ == "__main__":
    key = jax.random.PRNGKey(0)
    kp, kx = jax.random.split(key)
    params = _init_params(kp, in_channel=3)

    # PyTorch-convention NCHW input: batch=2, channels=3, spatial=16x16.
    image = jax.random.uniform(kx, (2, 3, 16, 16), jnp.float32)

    lowered = lower_discriminator_weights(params, (16, 16), in_channel=3)
    fwd = jax.jit(discriminator_forward)

    out = jax.block_until_ready(fwd(image, lowered))
    ref = jax.block_until_ready(_reference_forward(image, params))

    assert out.shape == (), f"expected scalar, got {out.shape}"
    err = abs(float(out) - float(ref))
    assert err < 1e-3 + 1e-2 * abs(float(ref)), (float(out), float(ref), err)
    print("KERNEL_OK")
</pallas_src>

<mosaic_0001>
module attributes {stable_mosaic.version = 11 : i64} {
  func.func @_discriminator_kernel(%arg0: i32, %arg1: memref<8x768xf32, #tpu.memory_space<vmem>>, %arg2: memref<768x512xf32, #tpu.memory_space<vmem>>, %arg3: memref<1x512xf32, #tpu.memory_space<vmem>>, %arg4: memref<512x256xf32, #tpu.memory_space<vmem>>, %arg5: memref<1x256xf32, #tpu.memory_space<vmem>>, %arg6: memref<256x128xf32, #tpu.memory_space<vmem>>, %arg7: memref<1x128xf32, #tpu.memory_space<vmem>>, %arg8: memref<128x64xf32, #tpu.memory_space<vmem>>, %arg9: memref<1x64xf32, #tpu.memory_space<vmem>>, %arg10: memref<1x64xf32, #tpu.memory_space<vmem>>, %arg11: memref<1x1xf32, #tpu.memory_space<vmem>>, %arg12: memref<1x1xf32, #tpu.memory_space<vmem>>) attributes {dimension_semantics = [#tpu.dimension_semantics<arbitrary>], iteration_bounds = array<i64: 1>, scalar_prefetch = 0 : i64, scratch_operands = 0 : i64, tpu.core_type = #tpu.core_type<tc>, window_params = [{transform_indices = @transform_0, window_bounds = array<i64: 8, 768>}, {pipeline_mode = #tpu.pipeline_mode<synchronous>, transform_indices = @transform_1, window_bounds = array<i64: 768, 512>}, {pipeline_mode = #tpu.pipeline_mode<synchronous>, transform_indices = @transform_2, window_bounds = array<i64: 1, 512>}, {pipeline_mode = #tpu.pipeline_mode<synchronous>, transform_indices = @transform_3, window_bounds = array<i64: 512, 256>}, {pipeline_mode = #tpu.pipeline_mode<synchronous>, transform_indices = @transform_4, window_bounds = array<i64: 1, 256>}, {pipeline_mode = #tpu.pipeline_mode<synchronous>, transform_indices = @transform_5, window_bounds = array<i64: 256, 128>}, {pipeline_mode = #tpu.pipeline_mode<synchronous>, transform_indices = @transform_6, window_bounds = array<i64: 1, 128>}, {pipeline_mode = #tpu.pipeline_mode<synchronous>, transform_indices = @transform_7, window_bounds = array<i64: 128, 64>}, {pipeline_mode = #tpu.pipeline_mode<synchronous>, transform_indices = @transform_8, window_bounds = array<i64: 1, 64>}, {pipeline_mode = #tpu.pipeline_mode<synchronous>, transform_indices = @transform_9, window_bounds = array<i64: 1, 64>}, {pipeline_mode = #tpu.pipeline_mode<synchronous>, transform_indices = @transform_10, window_bounds = array<i64: 1, 1>}, {pipeline_mode = #tpu.pipeline_mode<synchronous>, transform_indices = @transform_11, window_bounds = array<i64: 1, 1>}]} {
    %c0 = arith.constant 0 : index
    %c0_0 = arith.constant 0 : index
    %0 = vector.load %arg1[%c0, %c0_0] : memref<8x768xf32, #tpu.memory_space<vmem>>, vector<8x768xf32>
    %cst = arith.constant 5.000000e-01 : f32
    %1 = vector.broadcast %cst : f32 to vector<8x768xf32>
    %2 = arith.subf %0, %1 : vector<8x768xf32>
    %c0_1 = arith.constant 0 : index
    %c0_2 = arith.constant 0 : index
    %3 = vector.load %arg2[%c0_1, %c0_2] : memref<768x512xf32, #tpu.memory_space<vmem>>, vector<768x512xf32>
    %cst_3 = arith.constant dense<0.000000e+00> : vector<8x512xf32>
    %4 = tpu.matmul %2, %3, %cst_3 {dimension_numbers = #tpu.dot_dimension_numbers<[1], [0], [0], [1], [0, 0, 1, 1], [], []>} : vector<8x768xf32>, vector<768x512xf32>, vector<8x512xf32> -> vector<8x512xf32>
    %c0_4 = arith.constant 0 : index
    %c0_5 = arith.constant 0 : index
    %5 = vector.load %arg3[%c0_4, %c0_5] : memref<1x512xf32, #tpu.memory_space<vmem>>, vector<1x512xf32>
    %6 = vector.broadcast %5 : vector<1x512xf32> to vector<8x512xf32>
    %7 = arith.addf %4, %6 : vector<8x512xf32>
    %cst_6 = arith.constant 0.000000e+00 : f32
    %8 = vector.broadcast %cst_6 : f32 to vector<8x512xf32>
    %9 = arith.maximumf %7, %8 : vector<8x512xf32>
    %c0_7 = arith.constant 0 : index
    %c0_8 = arith.constant 0 : index
    %10 = vector.load %arg4[%c0_7, %c0_8] : memref<512x256xf32, #tpu.memory_space<vmem>>, vector<512x256xf32>
    %cst_9 = arith.constant dense<0.000000e+00> : vector<8x256xf32>
    %11 = tpu.matmul %9, %10, %cst_9 {dimension_numbers = #tpu.dot_dimension_numbers<[1], [0], [0], [1], [0, 0, 1, 1], [], []>} : vector<8x512xf32>, vector<512x256xf32>, vector<8x256xf32> -> vector<8x256xf32>
    %c0_10 = arith.constant 0 : index
    %c0_11 = arith.constant 0 : index
    %12 = vector.load %arg5[%c0_10, %c0_11] : memref<1x256xf32, #tpu.memory_space<vmem>>, vector<1x256xf32>
    %13 = vector.broadcast %12 : vector<1x256xf32> to vector<8x256xf32>
    %14 = arith.addf %11, %13 : vector<8x256xf32>
    %cst_12 = arith.constant 0.000000e+00 : f32
    %15 = vector.broadcast %cst_12 : f32 to vector<8x256xf32>
    %16 = arith.maximumf %14, %15 : vector<8x256xf32>
    %c0_13 = arith.constant 0 : index
    %c0_14 = arith.constant 0 : index
    %17 = vector.load %arg6[%c0_13, %c0_14] : memref<256x128xf32, #tpu.memory_space<vmem>>, vector<256x128xf32>
    %cst_15 = arith.constant dense<0.000000e+00> : vector<8x128xf32>
    %18 = tpu.matmul %16, %17, %cst_15 {dimension_numbers = #tpu.dot_dimension_numbers<[1], [0], [0], [1], [0, 0, 1, 1], [], []>} : vector<8x256xf32>, vector<256x128xf32>, vector<8x128xf32> -> vector<8x128xf32>
    %c0_16 = arith.constant 0 : index
    %c0_17 = arith.constant 0 : index
    %19 = vector.load %arg7[%c0_16, %c0_17] : memref<1x128xf32, #tpu.memory_space<vmem>>, vector<1x128xf32>
    %20 = vector.broadcast %19 : vector<1x128xf32> to vector<8x128xf32>
    %21 = arith.addf %18, %20 : vector<8x128xf32>
    %cst_18 = arith.constant 0.000000e+00 : f32
    %22 = vector.broadcast %cst_18 : f32 to vector<8x128xf32>
    %23 = arith.maximumf %21, %22 : vector<8x128xf32>
    %c0_19 = arith.constant 0 : index
    %c0_20 = arith.constant 0 : index
    %24 = vector.load %arg8[%c0_19, %c0_20] : memref<128x64xf32, #tpu.memory_space<vmem>>, vector<128x64xf32>
    %cst_21 = arith.constant dense<0.000000e+00> : vector<8x64xf32>
    %25 = tpu.matmul %23, %24, %cst_21 {dimension_numbers = #tpu.dot_dimension_numbers<[1], [0], [0], [1], [0, 0, 1, 1], [], []>} : vector<8x128xf32>, vector<128x64xf32>, vector<8x64xf32> -> vector<8x64xf32>
    %c0_22 = arith.constant 0 : index
    %c0_23 = arith.constant 0 : index
    %26 = vector.load %arg9[%c0_22, %c0_23] : memref<1x64xf32, #tpu.memory_space<vmem>>, vector<1x64xf32>
    %27 = vector.broadcast %26 : vector<1x64xf32> to vector<8x64xf32>
    %28 = arith.addf %25, %27 : vector<8x64xf32>
    %cst_24 = arith.constant 0.000000e+00 : f32
    %29 = vector.broadcast %cst_24 : f32 to vector<8x64xf32>
    %30 = arith.maximumf %28, %29 : vector<8x64xf32>
    %c0_25 = arith.constant 0 : index
    %c0_26 = arith.constant 0 : index
    %31 = vector.load %arg10[%c0_25, %c0_26] : memref<1x64xf32, #tpu.memory_space<vmem>>, vector<1x64xf32>
    %32 = vector.broadcast %31 : vector<1x64xf32> to vector<8x64xf32>
    %33 = arith.mulf %30, %32 : vector<8x64xf32>
    %cst_27 = arith.constant dense<0.000000e+00> : vector<8xf32>
    %34 = vector.multi_reduction <add>, %33, %cst_27 [1] : vector<8x64xf32> to vector<8xf32>
    %35 = vector.shape_cast %34 : vector<8xf32> to vector<8x1xf32>
    %c0_28 = arith.constant 0 : index
    %c0_29 = arith.constant 0 : index
    %36 = vector.load %arg11[%c0_28, %c0_29] : memref<1x1xf32, #tpu.memory_space<vmem>>, vector<1x1xf32>
    %37 = vector.broadcast %36 : vector<1x1xf32> to vector<8x1xf32>
    %38 = arith.addf %35, %37 : vector<8x1xf32>
    %cst_30 = arith.constant 0.000000e+00 : f32
    %39 = vector.broadcast %cst_30 : f32 to vector<8x1xf32>
    %40 = arith.maximumf %38, %39 : vector<8x1xf32>
    %c8_i32 = arith.constant 8 : i32
    %41 = arith.muli %arg0, %c8_i32 : i32
    %42 = tpu.iota {dimensions = array<i32: 0>} : vector<8x1xi32>
    %43 = vector.broadcast %41 : i32 to vector<8x1xi32>
    %44 = arith.addi %43, %42 : vector<8x1xi32>
    %c2_i32 = arith.constant 2 : i32
    %45 = vector.broadcast %c2_i32 : i32 to vector<8x1xi32>
    %46 = arith.cmpi slt, %44, %45 : vector<8x1xi32>
    %cst_31 = arith.constant 0.000000e+00 : f32
    %47 = vector.broadcast %cst_31 : f32 to vector<8x1xf32>
    %48 = arith.select %46, %40, %47 : vector<8x1xi1>, vector<8x1xf32>
    %cst_32 = arith.constant dense<0.000000e+00> : vector<8xf32>
    %49 = vector.multi_reduction <add>, %48, %cst_32 [1] : vector<8x1xf32> to vector<8xf32>
    %50 = vector.shape_cast %49 : vector<8xf32> to vector<8x1xf32>
    %cst_33 = arith.constant dense<0.000000e+00> : vector<1xf32>
    %51 = vector.multi_reduction <add>, %50, %cst_33 [0] : vector<8x1xf32> to vector<1xf32>
    %52 = vector.shape_cast %51 : vector<1xf32> to vector<1x1xf32>
    %c0_i32 = arith.constant 0 : i32
    %53 = arith.cmpi eq, %arg0, %c0_i32 : i32
    %54 = arith.extui %53 : i1 to i32
    %c0_i32_34 = arith.constant 0 : i32
    %55 = arith.cmpi ne, %54, %c0_i32_34 : i32
    scf.if %55 {
      %cst_41 = arith.constant 0.000000e+00 : f32
      %62 = vector.broadcast %cst_41 : f32 to vector<1x1xf32>
      %c0_42 = arith.constant 0 : index
      %c0_43 = arith.constant 0 : index
      %63 = vector.load %arg12[%c0_42, %c0_43] : memref<1x1xf32, #tpu.memory_space<vmem>>, vector<1x1xf32>
      tpu.vector_store %arg12[%c0_42, %c0_43], %62 {strides = array<i32>} : memref<1x1xf32, #tpu.memory_space<vmem>>, vector<1x1xf32>,
    } else {
    }
    %c0_35 = arith.constant 0 : index
    %c0_36 = arith.constant 0 : index
    %56 = vector.load %arg12[%c0_35, %c0_36] : memref<1x1xf32, #tpu.memory_space<vmem>>, vector<1x1xf32>
    %57 = arith.addf %56, %52 : vector<1x1xf32>
    %c0_37 = arith.constant 0 : index
    %c0_38 = arith.constant 0 : index
    %58 = vector.load %arg12[%c0_37, %c0_38] : memref<1x1xf32, #tpu.memory_space<vmem>>, vector<1x1xf32>
    tpu.vector_store %arg12[%c0_37, %c0_38], %57 {strides = array<i32>} : memref<1x1xf32, #tpu.memory_space<vmem>>, vector<1x1xf32>,
    %c0_i32_39 = arith.constant 0 : i32
    %59 = arith.cmpi eq, %arg0, %c0_i32_39 : i32
    %60 = arith.extui %59 : i1 to i32
    %c0_i32_40 = arith.constant 0 : i32
    %61 = arith.cmpi ne, %60, %c0_i32_40 : i32
    scf.if %61 {
      %c0_41 = arith.constant 0 : index
      %c0_42 = arith.constant 0 : index
      %62 = vector.load %arg12[%c0_41, %c0_42] : memref<1x1xf32, #tpu.memory_space<vmem>>, vector<1x1xf32>
      %cst_43 = arith.constant 5.000000e-01 : f32
      %63 = vector.broadcast %cst_43 : f32 to vector<1x1xf32>
      %64 = arith.mulf %62, %63 : vector<1x1xf32>
      %c0_44 = arith.constant 0 : index
      %c0_45 = arith.constant 0 : index
      %65 = vector.load %arg12[%c0_44, %c0_45] : memref<1x1xf32, #tpu.memory_space<vmem>>, vector<1x1xf32>
      tpu.vector_store %arg12[%c0_44, %c0_45], %64 {strides = array<i32>} : memref<1x1xf32, #tpu.memory_space<vmem>>, vector<1x1xf32>,
    } else {
    }
    return
  }
  func.func @transform_0(%arg0: i32) -> (i32, i32) {
    %c0_i32 = arith.constant 0 : i32
    %c0_i32_0 = arith.constant 0 : i32
    return %arg0, %c0_i32 : i32, i32
  }
  func.func @transform_1(%arg0: i32) -> (i32, i32) {
    %c0_i32 = arith.constant 0 : i32
    %c0_i32_0 = arith.constant 0 : i32
    %c0_i32_1 = arith.constant 0 : i32
    return %c0_i32, %c0_i32_0 : i32, i32
  }
  func.func @transform_2(%arg0: i32) -> (i32, i32) {
    %c0_i32 = arith.constant 0 : i32
    %c0_i32_0 = arith.constant 0 : i32
    %c0_i32_1 = arith.constant 0 : i32
    return %c0_i32, %c0_i32_0 : i32, i32
  }
  func.func @transform_3(%arg0: i32) -> (i32, i32) {
    %c0_i32 = arith.constant 0 : i32
    %c0_i32_0 = arith.constant 0 : i32
    %c0_i32_1 = arith.constant 0 : i32
    return %c0_i32, %c0_i32_0 : i32, i32
  }
  func.func @transform_4(%arg0: i32) -> (i32, i32) {
    %c0_i32 = arith.constant 0 : i32
    %c0_i32_0 = arith.constant 0 : i32
    %c0_i32_1 = arith.constant 0 : i32
    return %c0_i32, %c0_i32_0 : i32, i32
  }
  func.func @transform_5(%arg0: i32) -> (i32, i32) {
    %c0_i32 = arith.constant 0 : i32
    %c0_i32_0 = arith.constant 0 : i32
    %c0_i32_1 = arith.constant 0 : i32
    return %c0_i32, %c0_i32_0 : i32, i32
  }
  func.func @transform_6(%arg0: i32) -> (i32, i32) {
    %c0_i32 = arith.constant 0 : i32
    %c0_i32_0 = arith.constant 0 : i32
    %c0_i32_1 = arith.constant 0 : i32
    return %c0_i32, %c0_i32_0 : i32, i32
  }
  func.func @transform_7(%arg0: i32) -> (i32, i32) {
    %c0_i32 = arith.constant 0 : i32
    %c0_i32_0 = arith.constant 0 : i32
    %c0_i32_1 = arith.constant 0 : i32
    return %c0_i32, %c0_i32_0 : i32, i32
  }
  func.func @transform_8(%arg0: i32) -> (i32, i32) {
    %c0_i32 = arith.constant 0 : i32
    %c0_i32_0 = arith.constant 0 : i32
    %c0_i32_1 = arith.constant 0 : i32
    return %c0_i32, %c0_i32_0 : i32, i32
  }
  func.func @transform_9(%arg0: i32) -> (i32, i32) {
    %c0_i32 = arith.constant 0 : i32
    %c0_i32_0 = arith.constant 0 : i32
    %c0_i32_1 = arith.constant 0 : i32
    return %c0_i32, %c0_i32_0 : i32, i32
  }
  func.func @transform_10(%arg0: i32) -> (i32, i32) {
    %c0_i32 = arith.constant 0 : i32
    %c0_i32_0 = arith.constant 0 : i32
    %c0_i32_1 = arith.constant 0 : i32
    return %c0_i32, %c0_i32_0 : i32, i32
  }
  func.func @transform_11(%arg0: i32) -> (i32, i32) {
    %c0_i32 = arith.constant 0 : i32
    %c0_i32_0 = arith.constant 0 : i32
    %c0_i32_1 = arith.constant 0 : i32
    return %c0_i32, %c0_i32_0 : i32, i32
  }
}

</mosaic_0001>

<bundles_post_ra>
// kernel: discriminator_forward.1
= control target key start
LH: loop header
LB: loop body
LE: loop exit
PB: predicated region body
PF: predicated region fallthrough
CT: control target
= control target key end

     0   :  { %s2746_s0 = inlined_call_operand.vmem [shape: f32[8,768], index: 0, kind: input, shape index: {}]   ;;  %s2747_s1 = inlined_call_operand.hbm [shape: f32[768,512], index: 1, kind: input, shape index: {}]   ;;  %s2748_s2 = inlined_call_operand.hbm [shape: f32[1,512], index: 2, kind: input, shape index: {}]   ;;  %s2749_s3 = inlined_call_operand.hbm [shape: f32[512,256], index: 3, kind: input, shape index: {}]   ;;  %s2750_s4 = inlined_call_operand.hbm [shape: f32[1,256], index: 4, kind: input, shape index: {}]   ;;  %s2751_s5 = inlined_call_operand.hbm [shape: f32[256,128], index: 5, kind: input, shape index: {}]   ;;  %s2752_s6 = inlined_call_operand.hbm [shape: f32[1,128], index: 6, kind: input, shape index: {}]   ;;  %s2753_s7 = inlined_call_operand.vmem [shape: f32[128,64], index: 7, kind: input, shape index: {}]   ;;  %s2754_s8 = inlined_call_operand.hbm [shape: f32[1,64], index: 8, kind: input, shape index: {}]   ;;  %s2755_s9 = inlined_call_operand.hbm [shape: f32[1,64], index: 9, kind: input, shape index: {}]   ;;  %s2756_s10 = inlined_call_operand.<no memory space> [shape: f32[1,1], index: 10, kind: input, shape index: {}]   ;;  %s2757_s11 = inlined_call_operand.hbm [shape: f32[1,1], index: 11, kind: output, shape index: {}]  }
   0x1   :  { %v16_v0 = vstv %s2756_s10 }
   0x2   :  { %17 = vst [vmem:[#allocation2] sm:$0x1] %v16_v0 }
   0x3   :  { %18 = vsyncpa [#allocation4], 0 }
   0x4   :  { %19 = vsyncpa [#allocation7], 0 }
   0x5   :  { %20 = vsyncpa [#allocation10], 0 }
   0x6   :  { %21 = vsyncpa [#allocation13], 0 }
   0x7   :  { %22 = vsyncpa [#allocation16], 0 }
   0x8   :  { %23 = vsyncpa [#allocation5], 0  ;;  %s2457_s19 = smov [#allocation6]   ;;  %s2458_s21 = smov [#allocation9]  }
   0x9   :  { %s44_s20 = sshll.u32 %s2457_s19, 4  ;;  %s66_s22 = sshll.u32 %s2458_s21, 4  ;;  %s45_s20 = int_to_ptr.vmem [resolvable:$true] %s44_s20  ;;  %s67_s22 = int_to_ptr.vmem [resolvable:$true] %s66_s22 }
   0xa   :  { %s2247_s25 = scalar_lea.hbm %s2748_s2, 64 }
   0xb   :  { %p2248_p0 = scmp.ne.s32.totalorder %s2748_s2, %s2247_s25  ;;  %p2251_p1 = scmp.lt.u32.totalorder %s2247_s25, %s2748_s2 }
   0xd   :  { %p2253_p2 = pnand %p2251_p1, %p2248_p0 }
   0xf   :  { %2256 = shalt.err (!%p2253_p2)
}
  0x10   :  { %s2257_s29 = scalar_lea.vmem %s45_s20, 64  ;;  %p2262_p4 = scmp.lt.s32.totalorder %s45_s20, %s45_s20 }
  0x11   :  { %p2258_p3 = scmp.ne.s32.totalorder %s45_s20, %s2257_s29  ;;  %p2263_p5 = scmp.lt.s32.totalorder %s2257_s29, %s2257_s29 }
  0x13   :  { %p2264_p6 = por %p2263_p5, %p2262_p4 }
  0x15   :  { %p2265_p7 = pnand %p2264_p6, %p2258_p3 }
  0x17   :  { %2268 = shalt.err (!%p2265_p7)
}
  0x18   :  { %47 = dma.hbm_to_vmem [thread:$0]  %s2748_s2, 64, %s45_s20, [#allocation7]  }
  0x19   :  { %s2269_s15 = scalar_lea.hbm %s2750_s4, 32 }
  0x1a   :  { %p2270_p8 = scmp.ne.s32.totalorder %s2750_s4, %s2269_s15  ;;  %p2273_p9 = scmp.lt.u32.totalorder %s2269_s15, %s2750_s4 }
  0x1c   :  { %p2275_p10 = pnand %p2273_p9, %p2270_p8 }
  0x1e   :  { %2278 = shalt.err (!%p2275_p10)
}
  0x1f   :  { %s2279_s21 = scalar_lea.vmem %s67_s22, 32  ;;  %p2284_p12 = scmp.lt.s32.totalorder %s67_s22, %s67_s22 }
  0x20   :  { %p2280_p11 = scmp.ne.s32.totalorder %s67_s22, %s2279_s21  ;;  %p2285_p13 = scmp.lt.s32.totalorder %s2279_s21, %s2279_s21 }
  0x22   :  { %p2286_p0 = por %p2285_p13, %p2284_p12 }
  0x24   :  { %p2287_p1 = pnand %p2286_p0, %p2280_p11 }
  0x26   :  { %2290 = shalt.err (!%p2287_p1)
}
  0x27   :  { %69 = dma.hbm_to_vmem [thread:$0]  %s2750_s4, 32, %s67_s22, [#allocation10]  }
  0x28   :  { %s2459_s23 = smov [#allocation12]   ;;  %s2460_s25 = smov [#allocation3]  }
  0x29   :  { %s88_s24 = sshll.u32 %s2459_s23, 4  ;;  %s31_s26 = sshll.u32 %s2460_s25, 4  ;;  %s89_s24 = int_to_ptr.vmem [resolvable:$true] %s88_s24  ;;  %s2562_s26 = int_to_ptr.vmem [resolvable:$true] %s31_s26 }
  0x2a   :  { %s2291_s28 = scalar_lea.hbm %s2752_s6, 16 }
  0x2b   :  { %p2292_p2 = scmp.ne.s32.totalorder %s2752_s6, %s2291_s28  ;;  %p2295_p3 = scmp.lt.u32.totalorder %s2291_s28, %s2752_s6 }
  0x2d   :  { %p2297_p4 = pnand %p2295_p3, %p2292_p2 }
  0x2f   :  { %2300 = shalt.err (!%p2297_p4)
}
  0x30   :  { %s2301_s4 = scalar_lea.vmem %s89_s24, 16  ;;  %s2305_s22 = scalar_lea.vmem %s89_s24, 32 }
  0x31   :  { %p2302_p5 = scmp.ne.s32.totalorder %s89_s24, %s2301_s4  ;;  %p2306_p6 = scmp.lt.s32.totalorder %s89_s24, %s89_s24 }
  0x32   :  { %p2307_p7 = scmp.lt.s32.totalorder %s2305_s22, %s2301_s4 }
  0x34   :  { %p2308_p8 = por %p2307_p7, %p2306_p6 }
  0x36   :  { %p2309_p9 = pnand %p2308_p8, %p2302_p5 }
  0x38   :  { %2312 = shalt.err (!%p2309_p9)
}
  0x39   :  { %91 = dma.hbm_to_vmem [thread:$0]  %s2752_s6, 16, %s89_s24, [#allocation13]  }
  0x3a   :  { %s2313_s18 = scalar_lea.hbm %s2747_s1, 49152 }
  0x3b   :  { %p2314_p10 = scmp.ne.s32.totalorder %s2747_s1, %s2313_s18  ;;  %p2317_p11 = scmp.lt.u32.totalorder %s2313_s18, %s2747_s1 }
  0x3d   :  { %p2319_p12 = pnand %p2317_p11, %p2314_p10 }
  0x3f   :  { %2322 = shalt.err (!%p2319_p12)
}
  0x40   :  { %s2323_s23 = scalar_lea.vmem %s2562_s26, 49152  ;;  %p2328_p0 = scmp.lt.s32.totalorder %s2562_s26, %s2562_s26 }
  0x41   :  { %p2324_p13 = scmp.ne.s32.totalorder %s2562_s26, %s2323_s23  ;;  %p2329_p1 = scmp.lt.s32.totalorder %s2323_s23, %s2323_s23 }
  0x43   :  { %p2330_p2 = por %p2329_p1, %p2328_p0 }
  0x45   :  { %p2331_p3 = pnand %p2330_p2, %p2324_p13 }
  0x47   :  { %2334 = shalt.err (!%p2331_p3)
}
  0x48   :  { %s2461_s6 = smov 512   ;;  %s2462_s24 = smov 32  }
  0x49   :  { %37 = dma.hbm_to_vmem [thread:$0]  %s2747_s1, 49152, %s2562_s26, [#allocation4], %s2461_s6, %s2461_s6, %s2462_s24  }
  0x4a   :  { %s2463_s10 = smov [#allocation8]   ;;  %s2335_s12 = scalar_lea.hbm %s2749_s3, 16384 }
  0x4b   :  { %s53_s28 = sshll.u32 %s2463_s10, 4  ;;  %p2336_p4 = scmp.ne.s32.totalorder %s2749_s3, %s2335_s12  ;;  %s54_s28 = int_to_ptr.vmem [resolvable:$true] %s53_s28 }
  0x4c   :  { %p2339_p5 = scmp.lt.u32.totalorder %s2335_s12, %s2749_s3 }
  0x4e   :  { %p2341_p6 = pnand %p2339_p5, %p2336_p4 }
  0x50   :  { %2344 = shalt.err (!%p2341_p6)
}
  0x51   :  { %s2345_s15 = scalar_lea.vmem %s54_s28, 16384  ;;  %p2350_p8 = scmp.lt.s32.totalorder %s54_s28, %s54_s28 }
  0x52   :  { %p2346_p7 = scmp.ne.s32.totalorder %s54_s28, %s2345_s15  ;;  %p2351_p9 = scmp.lt.s32.totalorder %s2345_s15, %s2345_s15 }
  0x54   :  { %p2352_p10 = por %p2351_p9, %p2350_p8 }
  0x56   :  { %p2353_p11 = pnand %p2352_p10, %p2346_p7 }
  0x58   :  { %2356 = shalt.err (!%p2353_p11)
}
  0x59   :  { %s2464_s1 = smov 256   ;;  %s2465_s26 = smov 16  }
  0x5a   :  { %59 = dma.hbm_to_vmem [thread:$0]  %s2749_s3, 16384, %s54_s28, [#allocation7], %s2464_s1, %s2464_s1, %s2465_s26  }
  0x5b   :  { %s2466_s18 = smov [#allocation11]   ;;  %s2357_s20 = scalar_lea.hbm %s2751_s5, 4096 }
  0x5c   :  { %s75_s19 = sshll.u32 %s2466_s18, 4  ;;  %p2358_p12 = scmp.ne.s32.totalorder %s2751_s5, %s2357_s20  ;;  %s76_s19 = int_to_ptr.vmem [resolvable:$true] %s75_s19 }
  0x5d   :  { %p2361_p13 = scmp.lt.u32.totalorder %s2357_s20, %s2751_s5 }
  0x5f   :  { %p2363_p0 = pnand %p2361_p13, %p2358_p12 }
  0x61   :  { %2366 = shalt.err (!%p2363_p0)
}
  0x62   :  { %s2367_s27 = scalar_lea.vmem %s76_s19, 4096  ;;  %p2372_p2 = scmp.lt.s32.totalorder %s76_s19, %s76_s19 }
  0x63   :  { %p2368_p1 = scmp.ne.s32.totalorder %s76_s19, %s2367_s27  ;;  %p2373_p3 = scmp.lt.s32.totalorder %s2367_s27, %s2367_s27 }
  0x65   :  { %p2374_p4 = por %p2373_p3, %p2372_p2 }
  0x67   :  { %p2375_p5 = pnand %p2374_p4, %p2368_p1 }
  0x69   :  { %2378 = shalt.err (!%p2375_p5)
}
  0x6a   :  { %s2467_s3 = smov 128   ;;  %s2468_s10 = smov 8  }
  0x6b   :  { %81 = dma.hbm_to_vmem [thread:$0]  %s2751_s5, 4096, %s76_s19, [#allocation10], %s2467_s3, %s2467_s3, %s2468_s10  }
  0x6c   :  { %s2469_s30 = smov [#allocation14]   ;;  %s2470_s13 = smov [#allocation15]  }
  0x6d   :  { %s100_s12 = sshll.u32 %s2469_s30, 4  ;;  %s110_s4 = sshll.u32 %s2470_s13, 4  ;;  %s101_s12 = int_to_ptr.vmem [resolvable:$true] %s100_s12  ;;  %s111_s4 = int_to_ptr.vmem [resolvable:$true] %s110_s4 }
  0x6e   :  { %s2379_s15 = scalar_lea.hbm %s2754_s8, 16 }
  0x6f   :  { %p2380_p6 = scmp.ne.s32.totalorder %s2754_s8, %s2379_s15  ;;  %p2383_p7 = scmp.lt.u32.totalorder %s2379_s15, %s2754_s8 }
  0x71   :  { %p2385_p8 = pnand %p2383_p7, %p2380_p6 }
  0x73   :  { %2388 = shalt.err (!%p2385_p8)
}
  0x74   :  { %s2389_s5 = scalar_lea.vmem %s101_s12, 16  ;;  %s2393_s18 = scalar_lea.vmem %s101_s12, 32 }
  0x75   :  { %p2390_p9 = scmp.ne.s32.totalorder %s101_s12, %s2389_s5  ;;  %p2394_p10 = scmp.lt.s32.totalorder %s101_s12, %s101_s12 }
  0x76   :  { %p2395_p11 = scmp.lt.s32.totalorder %s2393_s18, %s2389_s5 }
  0x78   :  { %p2396_p12 = por %p2395_p11, %p2394_p10 }
  0x7a   :  { %p2397_p13 = pnand %p2396_p12, %p2390_p9 }
  0x7c   :  { %2400 = shalt.err (!%p2397_p13)
}
  0x7d   :  { %103 = dma.hbm_to_vmem [thread:$0]  %s2754_s8, 16, %s101_s12, [#allocation13]  }
  0x7e   :  { %s2401_s23 = scalar_lea.hbm %s2755_s9, 16 }
  0x7f   :  { %p2402_p0 = scmp.ne.s32.totalorder %s2755_s9, %s2401_s23  ;;  %p2405_p1 = scmp.lt.u32.totalorder %s2401_s23, %s2755_s9 }
  0x81   :  { %p2407_p2 = pnand %p2405_p1, %p2402_p0 }
  0x83   :  { %2410 = shalt.err (!%p2407_p2)
}
  0x84   :  { %s2411_s3 = scalar_lea.vmem %s111_s4, 16  ;;  %s2415_s10 = scalar_lea.vmem %s111_s4, 32 }
  0x85   :  { %p2412_p3 = scmp.ne.s32.totalorder %s111_s4, %s2411_s3  ;;  %p2416_p4 = scmp.lt.s32.totalorder %s111_s4, %s111_s4 }
  0x86   :  { %p2417_p5 = scmp.lt.s32.totalorder %s2415_s10, %s2411_s3 }
  0x88   :  { %p2418_p6 = por %p2417_p5, %p2416_p4 }
  0x8a   :  { %p2419_p7 = pnand %p2418_p6, %p2412_p3 }
  0x8c   :  { %2422 = shalt.err (!%p2419_p7)
}
  0x8d   :  { %113 = dma.hbm_to_vmem [thread:$0]  %s2755_s9, 16, %s111_s4, [#allocation16]  }
  0x8e   :  { %2445 = dma.done.wait [#allocation4], 49152  }
  0x8f   :  { %2446 = vsyncadd [#allocation4], 4294918144 }
  0x90   :  { %2447 = dma.done.wait [#allocation7], 16448  }
  0x91   :  { %2448 = vsyncadd [#allocation7], 4294950848 }
  0x92   :  { %2449 = dma.done.wait [#allocation10], 4128  }
  0x93   :  { %2450 = vsyncadd [#allocation10], 4294963168 }
  0x94   :  { %2451 = dma.done.wait [#allocation13], 32  }
  0x95   :  { %2452 = vsyncadd [#allocation13], 4294967264 }
  0x96   :  { %2453 = dma.done.wait [#allocation16], 16  }
  0x97   :  { %2454 = vsyncadd [#allocation16], 4294967280  ;;  %v153_v1 = vld [vmem:[#allocation3 + $0x8] sm:$0xff]  ;;  %v155_v3 = vld [vmem:[#allocation3 + $0x18] sm:$0xff]  ;;  %vm1517_vm0 = vcmask 0   ;;  %vm2472_vm1 = vmmov 0  }
  0x98   :  { %v157_v2 = vld [vmem:[#allocation3 + $0x28] sm:$0xff]  ;;  %v159_v5 = vld [vmem:[#allocation3 + $0x38] sm:$0xff]  ;;  %v152_v6 = vld [vmem:[#allocation3] sm:$0xff]  ;;  %vm1484_vm2 = vcmask 523264   ;;  %vm1505_vm4 = vcmask 7168  }
  0x99   :  { %v1645_v4 = vpack.c.bf16 %v157_v2, %v153_v1  ;;  %v156_v7 = vld [vmem:[#allocation3 + $0x20] sm:$0xff]  ;;  %v1837_v8 = vpack.c.bf16 %v159_v5, %v155_v3  ;;  %v154_v10 = vld [vmem:[#allocation3 + $0x10] sm:$0xff]  ;;  %v161_v12 = vld [vmem:[#allocation3 + $0x48] sm:$0xff] }
  0x9a   :  { %v1647_v9 = vpack.c.bf16 %v156_v7, %v152_v6  ;;  %v158_v11 = vld [vmem:[#allocation3 + $0x30] sm:$0xff]  ;;  %v165_v14 = vld [vmem:[#allocation3 + $0x68] sm:$0xff]  ;;  %v163_v15 = vld [vmem:[#allocation3 + $0x58] sm:$0xff] }
  0x9b   :  { %1646 = vmatprep.subr.bf16.mxu0 %v1645_v4  ;;  %v1839_v13 = vpack.c.bf16 %v158_v11, %v154_v10  ;;  %v167_v16 = vld [vmem:[#allocation3 + $0x78] sm:$0xff]  ;;  %1838 = vmatprep.subr.bf16.mxu1 %v1837_v8  ;;  %v1649_v17 = vpack.c.bf16 %v165_v14, %v161_v12  ;;  %v160_v19 = vld [vmem:[#allocation3 + $0x40] sm:$0xff]  ;;  %v162_v21 = vld [vmem:[#allocation3 + $0x50] sm:$0xff] }
  0x9c   :  { %1648 = vmatpush1.bf16.msra.mxu0 %v1647_v9  ;;  %v1841_v18 = vpack.c.bf16 %v167_v16, %v163_v15  ;;  %v164_v20 = vld [vmem:[#allocation3 + $0x60] sm:$0xff]  ;;  %v166_v23 = vld [vmem:[#allocation3 + $0x70] sm:$0xff]  ;;  %v169_v24 = vld [vmem:[#allocation3 + $0x88] sm:$0xff] }
  0x9d   :  { %1840 = vmatpush1.bf16.msra.mxu1 %v1839_v13  ;;  %v1651_v22 = vpack.c.bf16 %v164_v20, %v160_v19  ;;  %v173_v25 = vld [vmem:[#allocation3 + $0xa8] sm:$0xff]  ;;  %1650 = vmatprep.subr.bf16.mxu0 %v1649_v17  ;;  %v1843_v26 = vpack.c.bf16 %v166_v23, %v162_v21  ;;  %v171_v28 = vld [vmem:[#allocation3 + $0x98] sm:$0xff]  ;;  %v168_v30 = vld [vmem:[#allocation3 + $0x80] sm:$0xff] }
  0x9e   :  { %1842 = vmatprep.subr.bf16.mxu1 %v1841_v18  ;;  %v1653_v27 = vpack.c.bf16 %v173_v25, %v169_v24  ;;  %v175_v29 = vld [vmem:[#allocation3 + $0xb8] sm:$0xff]  ;;  %v172_v32 = vld [vmem:[#allocation3 + $0xa0] sm:$0xff]  ;;  %v170_v33 = vld [vmem:[#allocation3 + $0x90] sm:$0xff] }
  0x9f   :  { %v1845_v31 = vpack.c.bf16 %v175_v29, %v171_v28  ;;  %v174_v34 = vld [vmem:[#allocation3 + $0xb0] sm:$0xff]  ;;  %v1655_v35 = vpack.c.bf16 %v172_v32, %v168_v30  ;;  %v177_v36 = vld [vmem:[#allocation3 + $0xc8] sm:$0xff]  ;;  %v179_v38 = vld [vmem:[#allocation3 + $0xd8] sm:$0xff] }
  0xa0   :  { %1652 = vmatpush1.bf16.msra.mxu0 %v1651_v22  ;;  %v181_v37 = vld [vmem:[#allocation3 + $0xe8] sm:$0xff]  ;;  %v1847_v39 = vpack.c.bf16 %v174_v34, %v170_v33  ;;  %v183_v41 = vld [vmem:[#allocation3 + $0xf8] sm:$0xff]  ;;  %v176_v42 = vld [vmem:[#allocation3 + $0xc0] sm:$0xff] }
  0xa1   :  { %1844 = vmatpush1.bf16.msra.mxu1 %v1843_v26  ;;  %1654 = vmatprep.subr.bf16.mxu0 %v1653_v27  ;;  %v1657_v40 = vpack.c.bf16 %v181_v37, %v177_v36  ;;  %v180_v43 = vld [vmem:[#allocation3 + $0xe0] sm:$0xff]  ;;  %v1849_v44 = vpack.c.bf16 %v183_v41, %v179_v38  ;;  %v178_v45 = vld [vmem:[#allocation3 + $0xd0] sm:$0xff]  ;;  %v185_v47 = vld [vmem:[#allocation3 + $0x108] sm:$0xff] }
  0xa2   :  { %1846 = vmatprep.subr.bf16.mxu1 %v1845_v31  ;;  %v182_v46 = vld [vmem:[#allocation3 + $0xf0] sm:$0xff]  ;;  %v189_v48 = vld [vmem:[#allocation3 + $0x128] sm:$0xff]  ;;  %v187_v49 = vld [vmem:[#allocation3 + $0x118] sm:$0xff]  ;;  %v1659_v51 = vpack.c.bf16 %v180_v43, %v176_v42 }
  0xa3   :  { %v191_v50 = vld [vmem:[#allocation3 + $0x138] sm:$0xff]  ;;  %v1851_v52 = vpack.c.bf16 %v182_v46, %v178_v45  ;;  %v1661_v53 = vpack.c.bf16 %v189_v48, %v185_v47  ;;  %v184_v54 = vld [vmem:[#allocation3 + $0x100] sm:$0xff]  ;;  %v186_v56 = vld [vmem:[#allocation3 + $0x110] sm:$0xff] }
  0xa4   :  { %1656 = vmatpush1.bf16.msra.mxu0 %v1655_v35  ;;  %v188_v55 = vld [vmem:[#allocation3 + $0x120] sm:$0xff]  ;;  %v1853_v57 = vpack.c.bf16 %v191_v50, %v187_v49  ;;  %v190_v58 = vld [vmem:[#allocation3 + $0x130] sm:$0xff]  ;;  %v193_v59 = vld [vmem:[#allocation3 + $0x148] sm:$0xff] }
  0xa5   :  { %1848 = vmatpush1.bf16.msra.mxu1 %v1847_v39  ;;  %1658 = vmatprep.subr.bf16.mxu0 %v1657_v40  ;;  %v197_v60 = vld [vmem:[#allocation3 + $0x168] sm:$0xff]  ;;  %v195_v61 = vld [vmem:[#allocation3 + $0x158] sm:$0xff]  ;;  %v1663_v63 = vpack.c.bf16 %v188_v55, %v184_v54  ;;  %v1855_v0 = vpack.c.bf16 %v190_v58, %v186_v56  ;;  %v192_v2 = vld [vmem:[#allocation3 + $0x140] sm:$0xff] }
  0xa6   :  { %1850 = vmatprep.subr.bf16.mxu1 %v1849_v44  ;;  %v199_v62 = vld [vmem:[#allocation3 + $0x178] sm:$0xff]  ;;  %v1665_v1 = vpack.c.bf16 %v197_v60, %v193_v59  ;;  %v196_v3 = vld [vmem:[#allocation3 + $0x160] sm:$0xff]  ;;  %v194_v4 = vld [vmem:[#allocation3 + $0x150] sm:$0xff] }
  0xa7   :  { %v1857_v5 = vpack.c.bf16 %v199_v62, %v195_v61  ;;  %v198_v6 = vld [vmem:[#allocation3 + $0x170] sm:$0xff]  ;;  %v201_v7 = vld [vmem:[#allocation3 + $0x188] sm:$0xff]  ;;  %v203_v9 = vld [vmem:[#allocation3 + $0x198] sm:$0xff]  ;;  %v1667_v11 = vpack.c.bf16 %v196_v3, %v192_v2 }
  0xa8   :  { %1660 = vmatpush1.bf16.msra.mxu0 %v1659_v51  ;;  %v205_v8 = vld [vmem:[#allocation3 + $0x1a8] sm:$0xff]  ;;  %v207_v10 = vld [vmem:[#allocation3 + $0x1b8] sm:$0xff]  ;;  %v1859_v12 = vpack.c.bf16 %v198_v6, %v194_v4  ;;  %v200_v14 = vld [vmem:[#allocation3 + $0x180] sm:$0xff] }
  0xa9   :  { %1852 = vmatpush1.bf16.msra.mxu1 %v1851_v52  ;;  %1662 = vmatprep.subr.bf16.mxu0 %v1661_v53  ;;  %v1669_v13 = vpack.c.bf16 %v205_v8, %v201_v7  ;;  %v204_v15 = vld [vmem:[#allocation3 + $0x1a0] sm:$0xff]  ;;  %v202_v16 = vld [vmem:[#allocation3 + $0x190] sm:$0xff]  ;;  %v1861_v17 = vpack.c.bf16 %v207_v10, %v203_v9  ;;  %v209_v19 = vld [vmem:[#allocation3 + $0x1c8] sm:$0xff] }
  0xaa   :  { %1854 = vmatprep.subr.bf16.mxu1 %v1853_v57  ;;  %v206_v18 = vld [vmem:[#allocation3 + $0x1b0] sm:$0xff]  ;;  %v213_v20 = vld [vmem:[#allocation3 + $0x1e8] sm:$0xff]  ;;  %v211_v21 = vld [vmem:[#allocation3 + $0x1d8] sm:$0xff]  ;;  %v1671_v23 = vpack.c.bf16 %v204_v15, %v200_v14 }
  0xab   :  { %v215_v22 = vld [vmem:[#allocation3 + $0x1f8] sm:$0xff]  ;;  %v1863_v24 = vpack.c.bf16 %v206_v18, %v202_v16  ;;  %v1673_v25 = vpack.c.bf16 %v213_v20, %v209_v19  ;;  %v208_v26 = vld [vmem:[#allocation3 + $0x1c0] sm:$0xff]  ;;  %v210_v28 = vld [vmem:[#allocation3 + $0x1d0] sm:$0xff] }
  0xac   :  { %1664 = vmatpush1.bf16.msra.mxu0 %v1663_v63  ;;  %v212_v27 = vld [vmem:[#allocation3 + $0x1e0] sm:$0xff]  ;;  %v1865_v29 = vpack.c.bf16 %v215_v22, %v211_v21  ;;  %v214_v30 = vld [vmem:[#allocation3 + $0x1f0] sm:$0xff]  ;;  %v217_v31 = vld [vmem:[#allocation3 + $0x208] sm:$0xff] }
  0xad   :  { %1856 = vmatpush1.bf16.msra.mxu1 %v1855_v0  ;;  %1666 = vmatprep.subr.bf16.mxu0 %v1665_v1  ;;  %v221_v32 = vld [vmem:[#allocation3 + $0x228] sm:$0xff]  ;;  %v219_v33 = vld [vmem:[#allocation3 + $0x218] sm:$0xff]  ;;  %v1675_v35 = vpack.c.bf16 %v212_v27, %v208_v26  ;;  %v1867_v36 = vpack.c.bf16 %v214_v30, %v210_v28  ;;  %v216_v38 = vld [vmem:[#allocation3 + $0x200] sm:$0xff] }
  0xae   :  { %1858 = vmatprep.subr.bf16.mxu1 %v1857_v5  ;;  %v223_v34 = vld [vmem:[#allocation3 + $0x238] sm:$0xff]  ;;  %v1677_v37 = vpack.c.bf16 %v221_v32, %v217_v31  ;;  %v220_v39 = vld [vmem:[#allocation3 + $0x220] sm:$0xff]  ;;  %v218_v40 = vld [vmem:[#allocation3 + $0x210] sm:$0xff] }
  0xaf   :  { %v1869_v41 = vpack.c.bf16 %v223_v34, %v219_v33  ;;  %v222_v42 = vld [vmem:[#allocation3 + $0x230] sm:$0xff]  ;;  %v225_v43 = vld [vmem:[#allocation3 + $0x248] sm:$0xff]  ;;  %v227_v45 = vld [vmem:[#allocation3 + $0x258] sm:$0xff]  ;;  %v1679_v47 = vpack.c.bf16 %v220_v39, %v216_v38 }
  0xb0   :  { %1668 = vmatpush1.bf16.msra.mxu0 %v1667_v11  ;;  %v229_v44 = vld [vmem:[#allocation3 + $0x268] sm:$0xff]  ;;  %v231_v46 = vld [vmem:[#allocation3 + $0x278] sm:$0xff]  ;;  %v1871_v48 = vpack.c.bf16 %v222_v42, %v218_v40  ;;  %v224_v50 = vld [vmem:[#allocation3 + $0x240] sm:$0xff] }
  0xb1   :  { %1860 = vmatpush1.bf16.msra.mxu1 %v1859_v12  ;;  %1670 = vmatprep.subr.bf16.mxu0 %v1669_v13  ;;  %v1681_v49 = vpack.c.bf16 %v229_v44, %v225_v43  ;;  %v228_v51 = vld [vmem:[#allocation3 + $0x260] sm:$0xff]  ;;  %v226_v52 = vld [vmem:[#allocation3 + $0x250] sm:$0xff]  ;;  %v1873_v53 = vpack.c.bf16 %v231_v46, %v227_v45  ;;  %v233_v55 = vld [vmem:[#allocation3 + $0x288] sm:$0xff] }
  0xb2   :  { %1862 = vmatprep.subr.bf16.mxu1 %v1861_v17  ;;  %v230_v54 = vld [vmem:[#allocation3 + $0x270] sm:$0xff]  ;;  %v237_v56 = vld [vmem:[#allocation3 + $0x2a8] sm:$0xff]  ;;  %v235_v57 = vld [vmem:[#allocation3 + $0x298] sm:$0xff]  ;;  %v1683_v59 = vpack.c.bf16 %v228_v51, %v224_v50 }
  0xb3   :  { %v239_v58 = vld [vmem:[#allocation3 + $0x2b8] sm:$0xff]  ;;  %v1875_v60 = vpack.c.bf16 %v230_v54, %v226_v52  ;;  %v1685_v61 = vpack.c.bf16 %v237_v56, %v233_v55  ;;  %v232_v62 = vld [vmem:[#allocation3 + $0x280] sm:$0xff]  ;;  %v234_v0 = vld [vmem:[#allocation3 + $0x290] sm:$0xff] }
  0xb4   :  { %1672 = vmatpush1.bf16.msra.mxu0 %v1671_v23  ;;  %v236_v63 = vld [vmem:[#allocation3 + $0x2a0] sm:$0xff]  ;;  %v1877_v1 = vpack.c.bf16 %v239_v58, %v235_v57  ;;  %v238_v2 = vld [vmem:[#allocation3 + $0x2b0] sm:$0xff]  ;;  %v241_v3 = vld [vmem:[#allocation3 + $0x2c8] sm:$0xff] }
  0xb5   :  { %1864 = vmatpush1.bf16.msra.mxu1 %v1863_v24  ;;  %1674 = vmatprep.subr.bf16.mxu0 %v1673_v25  ;;  %v245_v4 = vld [vmem:[#allocation3 + $0x2e8] sm:$0xff]  ;;  %v243_v5 = vld [vmem:[#allocation3 + $0x2d8] sm:$0xff]  ;;  %v1687_v7 = vpack.c.bf16 %v236_v63, %v232_v62  ;;  %v240_v8 = vld [vmem:[#allocation3 + $0x2c0] sm:$0xff]  ;;  %v1879_v9 = vpack.c.bf16 %v238_v2, %v234_v0 }
  0xb6   :  { %1866 = vmatprep.subr.bf16.mxu1 %v1865_v29  ;;  %v247_v6 = vld [vmem:[#allocation3 + $0x2f8] sm:$0xff]  ;;  %v1689_v10 = vpack.c.bf16 %v245_v4, %v241_v3  ;;  %v244_v11 = vld [vmem:[#allocation3 + $0x2e0] sm:$0xff]  ;;  %v242_v12 = vld [vmem:[#allocation3 + $0x2d0] sm:$0xff] }
  0xb7   :  { %v246_v13 = vld [vmem:[#allocation3 + $0x2f0] sm:$0xff]  ;;  %v1881_v14 = vpack.c.bf16 %v247_v6, %v243_v5  ;;  %v249_v15 = vld [vmem:[#allocation3 + $0x308] sm:$0xff]  ;;  %v251_v18 = vld [vmem:[#allocation3 + $0x318] sm:$0xff]  ;;  %v1691_v21 = vpack.c.bf16 %v244_v11, %v240_v8 }
  0xb8   :  { %1676 = vmatpush1.bf16.msra.mxu0 %v1675_v35  ;;  %v253_v16 = vld [vmem:[#allocation3 + $0x328] sm:$0xff]  ;;  %v255_v19 = vld [vmem:[#allocation3 + $0x338] sm:$0xff]  ;;  %v1883_v22 = vpack.c.bf16 %v246_v13, %v242_v12  ;;  %v248_v24 = vld [vmem:[#allocation3 + $0x300] sm:$0xff] }
  0xb9   :  { %1868 = vmatpush1.bf16.msra.mxu1 %v1867_v36  ;;  %1678 = vmatprep.subr.bf16.mxu0 %v1677_v37  ;;  %v141_v17 = vld [vmem:[%s2746_s0 + $0x8] sm:$0xff]  ;;  %v1693_v23 = vpack.c.bf16 %v253_v16, %v249_v15  ;;  %v250_v26 = vld [vmem:[#allocation3 + $0x310] sm:$0xff]  ;;  %v1885_v27 = vpack.c.bf16 %v255_v19, %v251_v18  ;;  %v259_v31 = vld [vmem:[#allocation3 + $0x358] sm:$0xff] }
  0xba   :  { %1870 = vmatprep.subr.bf16.mxu1 %v1869_v41  ;;  %v1549_v20 = vadd.f32 -0.5, %v141_v17  ;;  %v252_v25 = vld [vmem:[#allocation3 + $0x320] sm:$0xff]  ;;  %v254_v28 = vld [vmem:[#allocation3 + $0x330] sm:$0xff]  ;;  %v257_v29 = vld [vmem:[#allocation3 + $0x348] sm:$0xff] }
  0xbb   :  { %v261_v30 = vld [vmem:[#allocation3 + $0x368] sm:$0xff]  ;;  %v263_v32 = vld [vmem:[#allocation3 + $0x378] sm:$0xff]  ;;  %v1695_v33 = vpack.c.bf16 %v252_v25, %v248_v24  ;;  %v1887_v34 = vpack.c.bf16 %v254_v28, %v250_v26  ;;  %v256_v36 = vld [vmem:[#allocation3 + $0x340] sm:$0xff] }
  0xbc   :  { %1680 = vmatpush1.bf16.msra.mxu0 %v1679_v47  ;;  %622 = vmatprep.mubr.f32.mxu0 %v1549_v20  ;;  %v1697_v35 = vpack.c.bf16 %v261_v30, %v257_v29  ;;  %v260_v37 = vld [vmem:[#allocation3 + $0x360] sm:$0xff]  ;;  %v258_v38 = vld [vmem:[#allocation3 + $0x350] sm:$0xff]  ;;  %v1889_v39 = vpack.c.bf16 %v263_v32, %v259_v31  ;;  %v265_v41 = vld [vmem:[#allocation3 + $0x388] sm:$0xff] }
  0xbd   :  { %1872 = vmatpush1.bf16.msra.mxu1 %v1871_v48  ;;  %1682 = vmatprep.subr.bf16.mxu0 %v1681_v49  ;;  %v262_v40 = vld [vmem:[#allocation3 + $0x370] sm:$0xff]  ;;  %v269_v42 = vld [vmem:[#allocation3 + $0x3a8] sm:$0xff]  ;;  %v267_v43 = vld [vmem:[#allocation3 + $0x398] sm:$0xff]  ;;  %v1699_v45 = vpack.c.bf16 %v260_v37, %v256_v36 }
  0xbe   :  { %1874 = vmatprep.subr.bf16.mxu1 %v1873_v53  ;;  %835 = vmatprep.mubr.f32.mxu1 %v1549_v20  ;;  %v271_v44 = vld [vmem:[#allocation3 + $0x3b8] sm:$0xff]  ;;  %v1891_v46 = vpack.c.bf16 %v262_v40, %v258_v38  ;;  %v1701_v47 = vpack.c.bf16 %v269_v42, %v265_v41  ;;  %v264_v48 = vld [vmem:[#allocation3 + $0x380] sm:$0xff]  ;;  %v266_v50 = vld [vmem:[#allocation3 + $0x390] sm:$0xff] }
  0xbf   :  { %v268_v49 = vld [vmem:[#allocation3 + $0x3a0] sm:$0xff]  ;;  %v1893_v51 = vpack.c.bf16 %v271_v44, %v267_v43  ;;  %v270_v52 = vld [vmem:[#allocation3 + $0x3b0] sm:$0xff]  ;;  %v273_v53 = vld [vmem:[#allocation3 + $0x3c8] sm:$0xff] }
  0xc0   :  { %1684 = vmatpush1.bf16.msra.mxu0 %v1683_v59  ;;  %v277_v54 = vld [vmem:[#allocation3 + $0x3e8] sm:$0xff]  ;;  %v275_v55 = vld [vmem:[#allocation3 + $0x3d8] sm:$0xff]  ;;  %v1703_v57 = vpack.c.bf16 %v268_v49, %v264_v48  ;;  %v1895_v58 = vpack.c.bf16 %v270_v52, %v266_v50  ;;  %v274_v62 = vld [vmem:[#allocation3 + $0x3d0] sm:$0xff] }
  0xc1   :  { %1876 = vmatpush1.bf16.msra.mxu1 %v1875_v60  ;;  %1686 = vmatprep.subr.bf16.mxu0 %v1685_v61  ;;  %v279_v56 = vld [vmem:[#allocation3 + $0x3f8] sm:$0xff]  ;;  %v1705_v59 = vpack.c.bf16 %v277_v54, %v273_v53  ;;  %v272_v60 = vld [vmem:[#allocation3 + $0x3c0] sm:$0xff]  ;;  %v278_v0 = vld [vmem:[#allocation3 + $0x3f0] sm:$0xff] }
  0xc2   :  { %1878 = vmatprep.subr.bf16.mxu1 %v1877_v1  ;;  %v276_v61 = vld [vmem:[#allocation3 + $0x3e0] sm:$0xff]  ;;  %v1897_v63 = vpack.c.bf16 %v279_v56, %v275_v55  ;;  %v281_v1 = vld [vmem:[#allocation3 + $0x408] sm:$0xff]  ;;  %v283_v3 = vld [vmem:[#allocation3 + $0x418] sm:$0xff] }
  0xc3   :  { %v285_v2 = vld [vmem:[#allocation3 + $0x428] sm:$0xff]  ;;  %v287_v4 = vld [vmem:[#allocation3 + $0x438] sm:$0xff]  ;;  %v1707_v5 = vpack.c.bf16 %v276_v61, %v272_v60  ;;  %v282_v11 = vld [vmem:[#allocation3 + $0x410] sm:$0xff] }
  0xc4   :  { %1688 = vmatpush1.bf16.msra.mxu0 %v1687_v7  ;;  %v140_v6 = vld [vmem:[%s2746_s0] sm:$0xff]  ;;  %v1899_v7 = vpack.c.bf16 %v278_v0, %v274_v62  ;;  %v1709_v8 = vpack.c.bf16 %v285_v2, %v281_v1  ;;  %v1901_v12 = vpack.c.bf16 %v287_v4, %v283_v3  ;;  %v286_v13 = vld [vmem:[#allocation3 + $0x430] sm:$0xff]  ;;  %v293_v15 = vld [vmem:[#allocation3 + $0x468] sm:$0xff] }
  0xc5   :  { %1880 = vmatpush1.bf16.msra.mxu1 %v1879_v9  ;;  %1690 = vmatprep.subr.bf16.mxu0 %v1689_v10  ;;  %v280_v9 = vld [vmem:[#allocation3 + $0x400] sm:$0xff]  ;;  %v1548_v16 = vadd.f32 -0.5, %v140_v6  ;;  %v291_v17 = vld [vmem:[#allocation3 + $0x458] sm:$0xff]  ;;  %v1903_v20 = vpack.c.bf16 %v286_v13, %v282_v11  ;;  %v290_v24 = vld [vmem:[#allocation3 + $0x450] sm:$0xff] }
  0xc6   :  { %1882 = vmatprep.subr.bf16.mxu1 %v1881_v14  ;;  %v284_v10 = vld [vmem:[#allocation3 + $0x420] sm:$0xff]  ;;  %v289_v14 = vld [vmem:[#allocation3 + $0x448] sm:$0xff]  ;;  %v295_v18 = vld [vmem:[#allocation3 + $0x478] sm:$0xff] }
  0xc7   :  { %v1711_v19 = vpack.c.bf16 %v284_v10, %v280_v9  ;;  %v1905_v25 = vpack.c.bf16 %v295_v18, %v291_v17  ;;  %v294_v26 = vld [vmem:[#allocation3 + $0x470] sm:$0xff]  ;;  %v301_v28 = vld [vmem:[#allocation3 + $0x4a8] sm:$0xff]  ;;  %v299_v29 = vld [vmem:[#allocation3 + $0x498] sm:$0xff] }
  0xc8   :  { %1692 = vmatpush1.bf16.msra.mxu0 %v1691_v21  ;;  %v1713_v21 = vpack.c.bf16 %v293_v15, %v289_v14  ;;  %v303_v30 = vld [vmem:[#allocation3 + $0x4b8] sm:$0xff]  ;;  %v1907_v32 = vpack.c.bf16 %v294_v26, %v290_v24  ;;  %v298_v36 = vld [vmem:[#allocation3 + $0x490] sm:$0xff]  ;;  %v309_v40 = vld [vmem:[#allocation3 + $0x4e8] sm:$0xff] }
  0xc9   :  { %1884 = vmatpush1.bf16.msra.mxu1 %v1883_v22  ;;  %1694 = vmatprep.subr.bf16.mxu0 %v1693_v23  ;;  %v288_v22 = vld [vmem:[#allocation3 + $0x440] sm:$0xff]  ;;  %v1909_v37 = vpack.c.bf16 %v303_v30, %v299_v29  ;;  %v302_v38 = vld [vmem:[#allocation3 + $0x4b0] sm:$0xff]  ;;  %v307_v41 = vld [vmem:[#allocation3 + $0x4d8] sm:$0xff] }
  0xca   :  { %1886 = vmatprep.subr.bf16.mxu1 %v1885_v27  ;;  %v292_v23 = vld [vmem:[#allocation3 + $0x460] sm:$0xff]  ;;  %v297_v27 = vld [vmem:[#allocation3 + $0x488] sm:$0xff]  ;;  %v311_v42 = vld [vmem:[#allocation3 + $0x4f8] sm:$0xff]  ;;  %v1911_v44 = vpack.c.bf16 %v302_v38, %v298_v36 }
  0xcb   :  { %v1715_v31 = vpack.c.bf16 %v292_v23, %v288_v22  ;;  %v306_v48 = vld [vmem:[#allocation3 + $0x4d0] sm:$0xff]  ;;  %v1913_v49 = vpack.c.bf16 %v311_v42, %v307_v41  ;;  %v317_v52 = vld [vmem:[#allocation3 + $0x528] sm:$0xff]  ;;  %v315_v53 = vld [vmem:[#allocation3 + $0x518] sm:$0xff] }
  0xcc   :  { %1696 = vmatpush1.bf16.msra.mxu0 %v1695_v33  ;;  %v1717_v33 = vpack.c.bf16 %v301_v28, %v297_v27  ;;  %v310_v50 = vld [vmem:[#allocation3 + $0x4f0] sm:$0xff]  ;;  %v319_v54 = vld [vmem:[#allocation3 + $0x538] sm:$0xff]  ;;  %v325_v0 = vld [vmem:[#allocation3 + $0x568] sm:$0xff] }
  0xcd   :  { %1888 = vmatpush1.bf16.msra.mxu1 %v1887_v34  ;;  %1698 = vmatprep.subr.bf16.mxu0 %v1697_v35  ;;  %v296_v34 = vld [vmem:[#allocation3 + $0x480] sm:$0xff]  ;;  %v1915_v56 = vpack.c.bf16 %v310_v50, %v306_v48  ;;  %v314_v60 = vld [vmem:[#allocation3 + $0x510] sm:$0xff]  ;;  %v1917_v61 = vpack.c.bf16 %v319_v54, %v315_v53  ;;  %v323_v1 = vld [vmem:[#allocation3 + $0x558] sm:$0xff] }
  0xce   :  { %1890 = vmatprep.subr.bf16.mxu1 %v1889_v39  ;;  %v300_v35 = vld [vmem:[#allocation3 + $0x4a0] sm:$0xff]  ;;  %v305_v39 = vld [vmem:[#allocation3 + $0x4c8] sm:$0xff]  ;;  %v318_v62 = vld [vmem:[#allocation3 + $0x530] sm:$0xff] }
  0xcf   :  { %v1719_v43 = vpack.c.bf16 %v300_v35, %v296_v34  ;;  %v327_v2 = vld [vmem:[#allocation3 + $0x578] sm:$0xff]  ;;  %v1919_v4 = vpack.c.bf16 %v318_v62, %v314_v60  ;;  %v320_v6 = vld [vmem:[#allocation3 + $0x540] sm:$0xff]  ;;  %v326_v10 = vld [vmem:[#allocation3 + $0x570] sm:$0xff] }
  0xd0   :  { %1700 = vmatpush1.bf16.msra.mxu0 %v1699_v45  ;;  %v1721_v45 = vpack.c.bf16 %v309_v40, %v305_v39  ;;  %v1921_v9 = vpack.c.bf16 %v327_v2, %v323_v1  ;;  %v329_v11 = vld [vmem:[#allocation3 + $0x588] sm:$0xff]  ;;  %v331_v13 = vld [vmem:[#allocation3 + $0x598] sm:$0xff]  ;;  %v338_v34 = vld [vmem:[#allocation3 + $0x5d0] sm:$0xff] }
  0xd1   :  { %1892 = vmatpush1.bf16.msra.mxu1 %v1891_v46  ;;  %1702 = vmatprep.subr.bf16.mxu0 %v1701_v47  ;;  %v304_v46 = vld [vmem:[#allocation3 + $0x4c0] sm:$0xff]  ;;  %v335_v14 = vld [vmem:[#allocation3 + $0x5b8] sm:$0xff]  ;;  %v337_v23 = vld [vmem:[#allocation3 + $0x5c8] sm:$0xff] }
  0xd2   :  { %1894 = vmatprep.subr.bf16.mxu1 %v1893_v51  ;;  %v308_v47 = vld [vmem:[#allocation3 + $0x4e0] sm:$0xff]  ;;  %v313_v51 = vld [vmem:[#allocation3 + $0x508] sm:$0xff]  ;;  %v1925_v22 = vpack.c.bf16 %v335_v14, %v331_v13  ;;  %v339_v26 = vld [vmem:[#allocation3 + $0x5d8] sm:$0xff] }
  0xd3   :  { %v1723_v55 = vpack.c.bf16 %v308_v47, %v304_v46  ;;  %v341_v24 = vld [vmem:[#allocation3 + $0x5e8] sm:$0xff]  ;;  %v343_v27 = vld [vmem:[#allocation3 + $0x5f8] sm:$0xff]  ;;  %v342_v36 = vld [vmem:[#allocation3 + $0x5f0] sm:$0xff] }
  0xd4   :  { %1704 = vmatpush1.bf16.msra.mxu0 %v1703_v57  ;;  %v1725_v57 = vpack.c.bf16 %v317_v52, %v313_v51  ;;  %v1929_v35 = vpack.c.bf16 %v343_v27, %v339_v26  ;;  %v349_v38 = vld [vmem:[#allocation3 + $0x628] sm:$0xff]  ;;  %v347_v39 = vld [vmem:[#allocation3 + $0x618] sm:$0xff]  ;;  %v1931_v42 = vpack.c.bf16 %v342_v36, %v338_v34  ;;  %v346_v46 = vld [vmem:[#allocation3 + $0x610] sm:$0xff] }
  0xd5   :  { %1896 = vmatpush1.bf16.msra.mxu1 %v1895_v58  ;;  %1706 = vmatprep.subr.bf16.mxu0 %v1705_v59  ;;  %v312_v58 = vld [vmem:[#allocation3 + $0x500] sm:$0xff]  ;;  %v351_v40 = vld [vmem:[#allocation3 + $0x638] sm:$0xff]  ;;  %v350_v48 = vld [vmem:[#allocation3 + $0x630] sm:$0xff] }
  0xd6   :  { %1898 = vmatprep.subr.bf16.mxu1 %v1897_v63  ;;  %v316_v59 = vld [vmem:[#allocation3 + $0x520] sm:$0xff]  ;;  %v321_v63 = vld [vmem:[#allocation3 + $0x548] sm:$0xff]  ;;  %v1933_v47 = vpack.c.bf16 %v351_v40, %v347_v39  ;;  %v355_v51 = vld [vmem:[#allocation3 + $0x658] sm:$0xff]  ;;  %v1935_v54 = vpack.c.bf16 %v350_v48, %v346_v46 }
  0xd7   :  { %v1727_v3 = vpack.c.bf16 %v316_v59, %v312_v58  ;;  %v357_v50 = vld [vmem:[#allocation3 + $0x668] sm:$0xff]  ;;  %v359_v52 = vld [vmem:[#allocation3 + $0x678] sm:$0xff]  ;;  %v354_v58 = vld [vmem:[#allocation3 + $0x650] sm:$0xff] }
  0xd8   :  { %1708 = vmatpush1.bf16.msra.mxu0 %v1707_v5  ;;  %v1729_v5 = vpack.c.bf16 %v325_v0, %v321_v63  ;;  %v1937_v59 = vpack.c.bf16 %v359_v52, %v355_v51  ;;  %v358_v60 = vld [vmem:[#allocation3 + $0x670] sm:$0xff]  ;;  %v365_v62 = vld [vmem:[#allocation3 + $0x6a8] sm:$0xff]  ;;  %v363_v63 = vld [vmem:[#allocation3 + $0x698] sm:$0xff] }
  0xd9   :  { %1900 = vmatpush1.bf16.msra.mxu1 %v1899_v7  ;;  %1710 = vmatprep.subr.bf16.mxu0 %v1709_v8  ;;  %v324_v7 = vld [vmem:[#allocation3 + $0x560] sm:$0xff]  ;;  %v322_v8 = vld [vmem:[#allocation3 + $0x550] sm:$0xff]  ;;  %v367_v0 = vld [vmem:[#allocation3 + $0x6b8] sm:$0xff]  ;;  %v1939_v2 = vpack.c.bf16 %v358_v60, %v354_v58 }
  0xda   :  { %1902 = vmatprep.subr.bf16.mxu1 %v1901_v12  ;;  %v333_v12 = vld [vmem:[#allocation3 + $0x5a8] sm:$0xff]  ;;  %v1731_v15 = vpack.c.bf16 %v324_v7, %v320_v6  ;;  %v1923_v17 = vpack.c.bf16 %v326_v10, %v322_v8  ;;  %v362_v6 = vld [vmem:[#allocation3 + $0x690] sm:$0xff]  ;;  %v1941_v7 = vpack.c.bf16 %v367_v0, %v363_v63  ;;  %v391_v36 = vld [vmem:[#allocation3 + $0x778] sm:$0xff] }
  0xdb   :  { %623 = vmatmul.mubr.f32.vlgmr.msra.gmra.mrb[0].mxu0 %v1548_v16  ;;  %v1733_v18 = vpack.c.bf16 %v333_v12, %v329_v11  ;;  %v366_v8 = vld [vmem:[#allocation3 + $0x6b0] sm:$0xff]  ;;  %v373_v10 = vld [vmem:[#allocation3 + $0x6e8] sm:$0xff]  ;;  %v371_v11 = vld [vmem:[#allocation3 + $0x6d8] sm:$0xff] }
  0xdc   :  { %1712 = vmatpush1.bf16.msra.mxu0 %v1711_v19  ;;  %836 = vmatmul.mubr.f32.vlgmr.msra.gmra.mrb[0].mxu1 %v1548_v16  ;;  %v328_v16 = vld [vmem:[#allocation3 + $0x580] sm:$0xff]  ;;  %v375_v12 = vld [vmem:[#allocation3 + $0x6f8] sm:$0xff]  ;;  %v1943_v14 = vpack.c.bf16 %v366_v8, %v362_v6  ;;  %v389_v34 = vld [vmem:[#allocation3 + $0x768] sm:$0xff] }
  0xdd   :  { %1904 = vmatpush1.bf16.msra.mxu1 %v1903_v20  ;;  %1714 = vmatprep.subr.bf16.mxu0 %v1713_v21  ;;  %v332_v19 = vld [vmem:[#allocation3 + $0x5a0] sm:$0xff]  ;;  %v330_v20 = vld [vmem:[#allocation3 + $0x590] sm:$0xff]  ;;  %v397_v46 = vld [vmem:[#allocation3 + $0x7a8] sm:$0xff] }
  0xde   :  { %1906 = vmatprep.subr.bf16.mxu1 %v1905_v25  ;;  %v334_v21 = vld [vmem:[#allocation3 + $0x5b0] sm:$0xff]  ;;  %v1735_v29 = vpack.c.bf16 %v332_v19, %v328_v16  ;;  %v368_v16 = vld [vmem:[#allocation3 + $0x6c0] sm:$0xff]  ;;  %v1945_v19 = vpack.c.bf16 %v375_v12, %v371_v11  ;;  %v399_v48 = vld [vmem:[#allocation3 + $0x7b8] sm:$0xff] }
  0xdf   :  { %v143_v25 = vld [vmem:[%s2746_s0 + $0x18] sm:$0xff]  ;;  %v1927_v30 = vpack.c.bf16 %v334_v21, %v330_v20  ;;  %v377_v21 = vld [vmem:[#allocation3 + $0x708] sm:$0xff]  ;;  %v384_v40 = vld [vmem:[#allocation3 + $0x740] sm:$0xff] }
  0xe0   :  { %1716 = vmatpush1.bf16.msra.mxu0 %v1715_v31  ;;  %v1551_v28 = vadd.f32 -0.5, %v143_v25  ;;  %v1737_v31 = vpack.c.bf16 %v341_v24, %v337_v23  ;;  %v374_v20 = vld [vmem:[#allocation3 + $0x6f0] sm:$0xff]  ;;  %v379_v23 = vld [vmem:[#allocation3 + $0x718] sm:$0xff]  ;;  %v392_v52 = vld [vmem:[#allocation3 + $0x780] sm:$0xff] }
  0xe1   :  { %1908 = vmatpush1.bf16.msra.mxu1 %v1907_v32  ;;  %1718 = vmatprep.subr.bf16.mxu0 %v1717_v33  ;;  %v336_v32 = vld [vmem:[#allocation3 + $0x5c0] sm:$0xff]  ;;  %v383_v24 = vld [vmem:[#allocation3 + $0x738] sm:$0xff]  ;;  %v405_v58 = vld [vmem:[#allocation3 + $0x7e8] sm:$0xff] }
  0xe2   :  { %1910 = vmatprep.subr.bf16.mxu1 %v1909_v37  ;;  %v340_v33 = vld [vmem:[#allocation3 + $0x5e0] sm:$0xff]  ;;  %v345_v37 = vld [vmem:[#allocation3 + $0x608] sm:$0xff]  ;;  %693 = vmatprep.mubr.f32.mxu0 %v1551_v28  ;;  %v407_v60 = vld [vmem:[#allocation3 + $0x7f8] sm:$0xff] }
  0xe3   :  { %906 = vmatprep.mubr.f32.mxu1 %v1551_v28  ;;  %v1739_v41 = vpack.c.bf16 %v340_v33, %v336_v32  ;;  %v376_v28 = vld [vmem:[#allocation3 + $0x700] sm:$0xff]  ;;  %v382_v32 = vld [vmem:[#allocation3 + $0x730] sm:$0xff]  ;;  %v385_v33 = vld [vmem:[#allocation3 + $0x748] sm:$0xff] }
  0xe4   :  { %1720 = vmatpush1.bf16.msra.mxu0 %v1719_v43  ;;  %v1741_v43 = vpack.c.bf16 %v349_v38, %v345_v37  ;;  %v1761_v39 = vpack.c.bf16 %v389_v34, %v385_v33  ;;  %v400_v0 = vld [vmem:[#allocation3 + $0x7c0] sm:$0xff]  ;;  %v413_v6 = vld [vmem:[#allocation3 + $0x828] sm:$0xff]  ;;  %v415_v8 = vld [vmem:[#allocation3 + $0x838] sm:$0xff] }
  0xe5   :  { %1912 = vmatpush1.bf16.msra.mxu1 %v1911_v44  ;;  %1722 = vmatprep.subr.bf16.mxu0 %v1721_v45  ;;  %v344_v44 = vld [vmem:[#allocation3 + $0x600] sm:$0xff]  ;;  %v429_v33 = vld [vmem:[#allocation3 + $0x8a8] sm:$0xff] }
  0xe6   :  { %1914 = vmatprep.subr.bf16.mxu1 %v1913_v49  ;;  %v348_v45 = vld [vmem:[#allocation3 + $0x620] sm:$0xff]  ;;  %v353_v49 = vld [vmem:[#allocation3 + $0x648] sm:$0xff] }
  0xe7   :  { %v1743_v53 = vpack.c.bf16 %v348_v45, %v344_v44  ;;  %v390_v44 = vld [vmem:[#allocation3 + $0x770] sm:$0xff]  ;;  %v393_v45 = vld [vmem:[#allocation3 + $0x788] sm:$0xff] }
  0xe8   :  { %1724 = vmatpush1.bf16.msra.mxu0 %v1723_v55  ;;  %v1745_v55 = vpack.c.bf16 %v357_v50, %v353_v49  ;;  %v1765_v51 = vpack.c.bf16 %v397_v46, %v393_v45  ;;  %v433_v45 = vld [vmem:[#allocation3 + $0x8c8] sm:$0xff] }
  0xe9   :  { %1916 = vmatpush1.bf16.msra.mxu1 %v1915_v56  ;;  %1726 = vmatprep.subr.bf16.mxu0 %v1725_v57  ;;  %v352_v56 = vld [vmem:[#allocation3 + $0x640] sm:$0xff]  ;;  %v437_v46 = vld [vmem:[#allocation3 + $0x8e8] sm:$0xff] }
  0xea   :  { %1918 = vmatprep.subr.bf16.mxu1 %v1917_v61  ;;  %v356_v57 = vld [vmem:[#allocation3 + $0x660] sm:$0xff]  ;;  %v361_v61 = vld [vmem:[#allocation3 + $0x688] sm:$0xff] }
  0xeb   :  { %v1747_v1 = vpack.c.bf16 %v356_v57, %v352_v56  ;;  %v398_v56 = vld [vmem:[#allocation3 + $0x7b0] sm:$0xff]  ;;  %v401_v57 = vld [vmem:[#allocation3 + $0x7c8] sm:$0xff] }
  0xec   :  { %1728 = vmatpush1.bf16.msra.mxu0 %v1727_v3  ;;  %v1749_v3 = vpack.c.bf16 %v365_v62, %v361_v61  ;;  %v1769_v63 = vpack.c.bf16 %v405_v58, %v401_v57  ;;  %v441_v57 = vld [vmem:[#allocation3 + $0x908] sm:$0xff] }
  0xed   :  { %1920 = vmatpush1.bf16.msra.mxu1 %v1919_v4  ;;  %1730 = vmatprep.subr.bf16.mxu0 %v1729_v5  ;;  %v360_v4 = vld [vmem:[#allocation3 + $0x680] sm:$0xff]  ;;  %v445_v58 = vld [vmem:[#allocation3 + $0x928] sm:$0xff] }
  0xee   :  { %1922 = vmatprep.subr.bf16.mxu1 %v1921_v9  ;;  %v364_v5 = vld [vmem:[#allocation3 + $0x6a0] sm:$0xff]  ;;  %v369_v9 = vld [vmem:[#allocation3 + $0x6c8] sm:$0xff] }
  0xef   :  { %v1751_v13 = vpack.c.bf16 %v364_v5, %v360_v4  ;;  %v406_v4 = vld [vmem:[#allocation3 + $0x7f0] sm:$0xff]  ;;  %v409_v5 = vld [vmem:[#allocation3 + $0x808] sm:$0xff] }
  0xf0   :  { %1732 = vmatpush1.bf16.msra.mxu0 %v1731_v15  ;;  %v1753_v15 = vpack.c.bf16 %v373_v10, %v369_v9  ;;  %v142_v10 = vld [vmem:[%s2746_s0 + $0x10] sm:$0xff]  ;;  %v1773_v12 = vpack.c.bf16 %v413_v6, %v409_v5 }
  0xf1   :  { %1924 = vmatpush1.bf16.msra.mxu1 %v1923_v17  ;;  %1734 = vmatprep.subr.bf16.mxu0 %v1733_v18  ;;  %v372_v17 = vld [vmem:[#allocation3 + $0x6e0] sm:$0xff]  ;;  %v370_v18 = vld [vmem:[#allocation3 + $0x6d0] sm:$0xff]  ;;  %v449_v5 = vld [vmem:[#allocation3 + $0x948] sm:$0xff] }
  0xf2   :  { %1926 = vmatprep.subr.bf16.mxu1 %v1925_v22  ;;  %v381_v22 = vld [vmem:[#allocation3 + $0x728] sm:$0xff]  ;;  %v1755_v25 = vpack.c.bf16 %v372_v17, %v368_v16  ;;  %v1947_v26 = vpack.c.bf16 %v374_v20, %v370_v18  ;;  %v414_v17 = vld [vmem:[#allocation3 + $0x830] sm:$0xff]  ;;  %v1550_v20 = vadd.f32 -0.5, %v142_v10 }
  0xf3   :  { %v1757_v27 = vpack.c.bf16 %v381_v22, %v377_v21  ;;  %v417_v18 = vld [vmem:[#allocation3 + $0x848] sm:$0xff]  ;;  %v419_v21 = vld [vmem:[#allocation3 + $0x858] sm:$0xff] }
  0xf4   :  { %1736 = vmatpush1.bf16.msra.mxu0 %v1735_v29  ;;  %v380_v29 = vld [vmem:[#allocation3 + $0x720] sm:$0xff]  ;;  %v423_v22 = vld [vmem:[#allocation3 + $0x878] sm:$0xff]  ;;  %v453_v6 = vld [vmem:[#allocation3 + $0x968] sm:$0xff] }
  0xf5   :  { %1928 = vmatpush1.bf16.msra.mxu1 %v1927_v30  ;;  %1738 = vmatprep.subr.bf16.mxu0 %v1737_v31  ;;  %v378_v30 = vld [vmem:[#allocation3 + $0x710] sm:$0xff]  ;;  %v1949_v31 = vpack.c.bf16 %v383_v24, %v379_v23  ;;  %v1759_v37 = vpack.c.bf16 %v380_v29, %v376_v28  ;;  %v416_v24 = vld [vmem:[#allocation3 + $0x840] sm:$0xff] }
  0xf6   :  { %1930 = vmatprep.subr.bf16.mxu1 %v1929_v35  ;;  %v387_v35 = vld [vmem:[#allocation3 + $0x758] sm:$0xff]  ;;  %v1951_v38 = vpack.c.bf16 %v382_v32, %v378_v30  ;;  %v418_v28 = vld [vmem:[#allocation3 + $0x850] sm:$0xff]  ;;  %v145_v29 = vld [vmem:[%s2746_s0 + $0x28] sm:$0xff]  ;;  %v1969_v30 = vpack.c.bf16 %v423_v22, %v419_v21 }
  0xf7   :  { %v425_v32 = vld [vmem:[#allocation3 + $0x888] sm:$0xff]  ;;  %v1553_v34 = vadd.f32 -0.5, %v145_v29 }
  0xf8   :  { %1740 = vmatpush1.bf16.msra.mxu0 %v1739_v41  ;;  %v388_v41 = vld [vmem:[#allocation3 + $0x760] sm:$0xff]  ;;  %v465_v29 = vld [vmem:[#allocation3 + $0x9c8] sm:$0xff] }
  0xf9   :  { %1932 = vmatpush1.bf16.msra.mxu1 %v1931_v42  ;;  %1742 = vmatprep.subr.bf16.mxu0 %v1741_v43  ;;  %v386_v42 = vld [vmem:[#allocation3 + $0x750] sm:$0xff]  ;;  %v1953_v43 = vpack.c.bf16 %v391_v36, %v387_v35  ;;  %v1763_v49 = vpack.c.bf16 %v388_v41, %v384_v40  ;;  %v427_v35 = vld [vmem:[#allocation3 + $0x898] sm:$0xff]  ;;  %v424_v40 = vld [vmem:[#allocation3 + $0x880] sm:$0xff] }
  0xfa   :  { %1934 = vmatprep.subr.bf16.mxu1 %v1933_v47  ;;  %v395_v47 = vld [vmem:[#allocation3 + $0x798] sm:$0xff]  ;;  %v1955_v50 = vpack.c.bf16 %v390_v44, %v386_v42  ;;  %v428_v41 = vld [vmem:[#allocation3 + $0x8a0] sm:$0xff]  ;;  %v426_v42 = vld [vmem:[#allocation3 + $0x890] sm:$0xff] }
  0xfb   :  { %v431_v36 = vld [vmem:[#allocation3 + $0x8b8] sm:$0xff]  ;;  %v430_v44 = vld [vmem:[#allocation3 + $0x8b0] sm:$0xff] }
  0xfc   :  { %1744 = vmatpush1.bf16.msra.mxu0 %v1743_v53  ;;  %v396_v53 = vld [vmem:[#allocation3 + $0x7a0] sm:$0xff] }
  0xfd   :  { %1936 = vmatpush1.bf16.msra.mxu1 %v1935_v54  ;;  %1746 = vmatprep.subr.bf16.mxu0 %v1745_v55  ;;  %v394_v54 = vld [vmem:[#allocation3 + $0x790] sm:$0xff]  ;;  %v1957_v55 = vpack.c.bf16 %v399_v48, %v395_v47  ;;  %v1767_v61 = vpack.c.bf16 %v396_v53, %v392_v52  ;;  %v435_v47 = vld [vmem:[#allocation3 + $0x8d8] sm:$0xff]  ;;  %v432_v52 = vld [vmem:[#allocation3 + $0x8c0] sm:$0xff] }
  0xfe   :  { %1938 = vmatprep.subr.bf16.mxu1 %v1937_v59  ;;  %v403_v59 = vld [vmem:[#allocation3 + $0x7d8] sm:$0xff]  ;;  %v1959_v62 = vpack.c.bf16 %v398_v56, %v394_v54  ;;  %v436_v53 = vld [vmem:[#allocation3 + $0x8e0] sm:$0xff]  ;;  %v434_v54 = vld [vmem:[#allocation3 + $0x8d0] sm:$0xff] }
  0xff   :  { %v439_v48 = vld [vmem:[#allocation3 + $0x8f8] sm:$0xff]  ;;  %v438_v56 = vld [vmem:[#allocation3 + $0x8f0] sm:$0xff] }
 0x100   :  { %1748 = vmatpush1.bf16.msra.mxu0 %v1747_v1  ;;  %v404_v1 = vld [vmem:[#allocation3 + $0x7e0] sm:$0xff] }
 0x101   :  { %1940 = vmatpush1.bf16.msra.mxu1 %v1939_v2  ;;  %1750 = vmatprep.subr.bf16.mxu0 %v1749_v3  ;;  %v402_v2 = vld [vmem:[#allocation3 + $0x7d0] sm:$0xff]  ;;  %v1961_v3 = vpack.c.bf16 %v407_v60, %v403_v59  ;;  %v1771_v9 = vpack.c.bf16 %v404_v1, %v400_v0  ;;  %v443_v59 = vld [vmem:[#allocation3 + $0x918] sm:$0xff]  ;;  %v440_v0 = vld [vmem:[#allocation3 + $0x900] sm:$0xff] }
 0x102   :  { %1942 = vmatprep.subr.bf16.mxu1 %v1941_v7  ;;  %v411_v7 = vld [vmem:[#allocation3 + $0x818] sm:$0xff]  ;;  %v1963_v11 = vpack.c.bf16 %v406_v4, %v402_v2  ;;  %v444_v1 = vld [vmem:[#allocation3 + $0x920] sm:$0xff]  ;;  %v442_v2 = vld [vmem:[#allocation3 + $0x910] sm:$0xff] }
 0x103   :  { %v1965_v16 = vpack.c.bf16 %v415_v8, %v411_v7  ;;  %v447_v60 = vld [vmem:[#allocation3 + $0x938] sm:$0xff]  ;;  %v446_v4 = vld [vmem:[#allocation3 + $0x930] sm:$0xff] }
 0x104   :  { %1752 = vmatpush1.bf16.msra.mxu0 %v1751_v13  ;;  %v408_v13 = vld [vmem:[#allocation3 + $0x800] sm:$0xff]  ;;  %v451_v7 = vld [vmem:[#allocation3 + $0x958] sm:$0xff]  ;;  %v1983_v10 = vpack.c.bf16 %v446_v4, %v442_v2  ;;  %v493_v2 = vld [vmem:[#allocation3 + $0xaa8] sm:$0xff] }
 0x105   :  { %1944 = vmatpush1.bf16.msra.mxu1 %v1943_v14  ;;  %1754 = vmatprep.subr.bf16.mxu0 %v1753_v15  ;;  %v412_v14 = vld [vmem:[#allocation3 + $0x820] sm:$0xff]  ;;  %v410_v15 = vld [vmem:[#allocation3 + $0x810] sm:$0xff]  ;;  %v455_v8 = vld [vmem:[#allocation3 + $0x978] sm:$0xff] }
 0x106   :  { %1946 = vmatprep.subr.bf16.mxu1 %v1945_v19  ;;  %v421_v19 = vld [vmem:[#allocation3 + $0x868] sm:$0xff]  ;;  %v1775_v23 = vpack.c.bf16 %v412_v14, %v408_v13  ;;  %v452_v13 = vld [vmem:[#allocation3 + $0x960] sm:$0xff]  ;;  %v450_v14 = vld [vmem:[#allocation3 + $0x950] sm:$0xff] }
 0x107   :  { %v495_v4 = vld [vmem:[#allocation3 + $0xab8] sm:$0xff] }
 0x108   :  { %1756 = vmatpush1.bf16.msra.mxu0 %v1755_v25  ;;  %v1967_v25 = vpack.c.bf16 %v414_v17, %v410_v15  ;;  %v1985_v15 = vpack.c.bf16 %v455_v8, %v451_v7  ;;  %v457_v17 = vld [vmem:[#allocation3 + $0x988] sm:$0xff]  ;;  %v488_v8 = vld [vmem:[#allocation3 + $0xa80] sm:$0xff] }
 0x109   :  { %1948 = vmatpush1.bf16.msra.mxu1 %v1947_v26  ;;  %1758 = vmatprep.subr.bf16.mxu0 %v1757_v27  ;;  %v1777_v26 = vpack.c.bf16 %v421_v19, %v417_v18  ;;  %v420_v27 = vld [vmem:[#allocation3 + $0x860] sm:$0xff]  ;;  %v461_v18 = vld [vmem:[#allocation3 + $0x9a8] sm:$0xff]  ;;  %v459_v19 = vld [vmem:[#allocation3 + $0x998] sm:$0xff] }
 0x10a   :  { %1950 = vmatprep.subr.bf16.mxu1 %v1949_v31  ;;  %v422_v31 = vld [vmem:[#allocation3 + $0x870] sm:$0xff] }
 0x10c   :  { %1760 = vmatpush1.bf16.msra.mxu0 %v1759_v37  ;;  %v1779_v37 = vpack.c.bf16 %v420_v27, %v416_v24  ;;  %v456_v24 = vld [vmem:[#allocation3 + $0x980] sm:$0xff] }
 0x10d   :  { %1952 = vmatpush1.bf16.msra.mxu1 %v1951_v38  ;;  %1762 = vmatprep.subr.bf16.mxu0 %v1761_v39  ;;  %v1971_v38 = vpack.c.bf16 %v422_v31, %v418_v28  ;;  %v1781_v39 = vpack.c.bf16 %v429_v33, %v425_v32  ;;  %v462_v28 = vld [vmem:[#allocation3 + $0x9b0] sm:$0xff]  ;;  %v467_v31 = vld [vmem:[#allocation3 + $0x9d8] sm:$0xff] }
 0x10e   :  { %1954 = vmatprep.subr.bf16.mxu1 %v1953_v43  ;;  %v1973_v43 = vpack.c.bf16 %v431_v36, %v427_v35  ;;  %v471_v32 = vld [vmem:[#allocation3 + $0x9f8] sm:$0xff]  ;;  %v464_v36 = vld [vmem:[#allocation3 + $0x9c0] sm:$0xff] }
 0x110   :  { %1764 = vmatpush1.bf16.msra.mxu0 %v1763_v49  ;;  %v1783_v49 = vpack.c.bf16 %v428_v41, %v424_v40  ;;  %v470_v40 = vld [vmem:[#allocation3 + $0x9f0] sm:$0xff]  ;;  %v473_v41 = vld [vmem:[#allocation3 + $0xa08] sm:$0xff] }
 0x111   :  { %1956 = vmatpush1.bf16.msra.mxu1 %v1955_v50  ;;  %1766 = vmatprep.subr.bf16.mxu0 %v1765_v51  ;;  %v1975_v50 = vpack.c.bf16 %v430_v44, %v426_v42  ;;  %v1785_v51 = vpack.c.bf16 %v437_v46, %v433_v45  ;;  %v477_v42 = vld [vmem:[#allocation3 + $0xa28] sm:$0xff]  ;;  %v479_v44 = vld [vmem:[#allocation3 + $0xa38] sm:$0xff] }
 0x112   :  { %1958 = vmatprep.subr.bf16.mxu1 %v1957_v55  ;;  %v1977_v55 = vpack.c.bf16 %v439_v48, %v435_v47  ;;  %v1805_v47 = vpack.c.bf16 %v477_v42, %v473_v41  ;;  %v472_v48 = vld [vmem:[#allocation3 + $0xa00] sm:$0xff] }
 0x114   :  { %1768 = vmatpush1.bf16.msra.mxu0 %v1767_v61  ;;  %v1787_v61 = vpack.c.bf16 %v436_v53, %v432_v52  ;;  %v478_v52 = vld [vmem:[#allocation3 + $0xa30] sm:$0xff]  ;;  %v481_v53 = vld [vmem:[#allocation3 + $0xa48] sm:$0xff] }
 0x115   :  { %1960 = vmatpush1.bf16.msra.mxu1 %v1959_v62  ;;  %1770 = vmatprep.subr.bf16.mxu0 %v1769_v63  ;;  %v1979_v62 = vpack.c.bf16 %v438_v56, %v434_v54  ;;  %v1789_v63 = vpack.c.bf16 %v445_v58, %v441_v57  ;;  %v485_v54 = vld [vmem:[#allocation3 + $0xa68] sm:$0xff]  ;;  %v487_v56 = vld [vmem:[#allocation3 + $0xa78] sm:$0xff] }
 0x116   :  { %1962 = vmatprep.subr.bf16.mxu1 %v1961_v3  ;;  %v1981_v3 = vpack.c.bf16 %v447_v60, %v443_v59  ;;  %v1809_v59 = vpack.c.bf16 %v485_v54, %v481_v53  ;;  %v480_v60 = vld [vmem:[#allocation3 + $0xa40] sm:$0xff] }
 0x118   :  { %1772 = vmatpush1.bf16.msra.mxu0 %v1771_v9  ;;  %v1791_v9 = vpack.c.bf16 %v444_v1, %v440_v0  ;;  %v486_v0 = vld [vmem:[#allocation3 + $0xa70] sm:$0xff]  ;;  %v489_v1 = vld [vmem:[#allocation3 + $0xa88] sm:$0xff] }
 0x119   :  { %1964 = vmatpush1.bf16.msra.mxu1 %v1963_v11  ;;  %1774 = vmatprep.subr.bf16.mxu0 %v1773_v12  ;;  %v1793_v11 = vpack.c.bf16 %v453_v6, %v449_v5  ;;  %v448_v12 = vld [vmem:[#allocation3 + $0x940] sm:$0xff]  ;;  %v1813_v7 = vpack.c.bf16 %v493_v2, %v489_v1 }
 0x11a   :  { %1966 = vmatprep.subr.bf16.mxu1 %v1965_v16  ;;  %v454_v16 = vld [vmem:[#allocation3 + $0x970] sm:$0xff]  ;;  %v1795_v21 = vpack.c.bf16 %v452_v13, %v448_v12  ;;  %v497_v13 = vld [vmem:[#allocation3 + $0xac8] sm:$0xff] }
 0x11b   :  { %694 = vmatmul.mubr.f32.vlgmr.msra.gmra.mrb[0].mxu0 %v1550_v20  ;;  %v1987_v22 = vpack.c.bf16 %v454_v16, %v450_v14  ;;  %v494_v12 = vld [vmem:[#allocation3 + $0xab0] sm:$0xff]  ;;  %v501_v14 = vld [vmem:[#allocation3 + $0xae8] sm:$0xff]  ;;  %v503_v16 = vld [vmem:[#allocation3 + $0xaf8] sm:$0xff] }
 0x11c   :  { %1776 = vmatpush1.bf16.msra.mxu0 %v1775_v23  ;;  %907 = vmatmul.mubr.f32.vlgmr.msra.gmra.mrb[0].mxu1 %v1550_v20  ;;  %v463_v20 = vld [vmem:[#allocation3 + $0x9b8] sm:$0xff]  ;;  %v1797_v23 = vpack.c.bf16 %v461_v18, %v457_v17 }
 0x11d   :  { %1968 = vmatpush1.bf16.msra.mxu1 %v1967_v25  ;;  %1778 = vmatprep.subr.bf16.mxu0 %v1777_v26  ;;  %v460_v25 = vld [vmem:[#allocation3 + $0x9a0] sm:$0xff]  ;;  %v458_v26 = vld [vmem:[#allocation3 + $0x990] sm:$0xff]  ;;  %v1989_v27 = vpack.c.bf16 %v463_v20, %v459_v19  ;;  %v1817_v19 = vpack.c.bf16 %v501_v14, %v497_v13 }
 0x11e   :  { %1970 = vmatprep.subr.bf16.mxu1 %v1969_v30  ;;  %764 = vmatprep.mubr.f32.mxu0 %v1553_v34  ;;  %v469_v30 = vld [vmem:[#allocation3 + $0x9e8] sm:$0xff]  ;;  %v1799_v33 = vpack.c.bf16 %v460_v25, %v456_v24  ;;  %v496_v20 = vld [vmem:[#allocation3 + $0xac0] sm:$0xff]  ;;  %v502_v24 = vld [vmem:[#allocation3 + $0xaf0] sm:$0xff] }
 0x11f   :  { %977 = vmatprep.mubr.f32.mxu1 %v1553_v34  ;;  %v1991_v34 = vpack.c.bf16 %v462_v28, %v458_v26  ;;  %v1801_v35 = vpack.c.bf16 %v469_v30, %v465_v29  ;;  %v505_v25 = vld [vmem:[#allocation3 + $0xb08] sm:$0xff]  ;;  %v511_v28 = vld [vmem:[#allocation3 + $0xb38] sm:$0xff] }
 0x120   :  { %1780 = vmatpush1.bf16.msra.mxu0 %v1779_v37  ;;  %v468_v37 = vld [vmem:[#allocation3 + $0x9e0] sm:$0xff]  ;;  %v509_v26 = vld [vmem:[#allocation3 + $0xb28] sm:$0xff] }
 0x121   :  { %1972 = vmatpush1.bf16.msra.mxu1 %v1971_v38  ;;  %1782 = vmatprep.subr.bf16.mxu0 %v1781_v39  ;;  %v466_v38 = vld [vmem:[#allocation3 + $0x9d0] sm:$0xff]  ;;  %v1993_v39 = vpack.c.bf16 %v471_v32, %v467_v31  ;;  %v1803_v45 = vpack.c.bf16 %v468_v37, %v464_v36  ;;  %v1821_v31 = vpack.c.bf16 %v509_v26, %v505_v25  ;;  %v504_v32 = vld [vmem:[#allocation3 + $0xb00] sm:$0xff]  ;;  %v513_v37 = vld [vmem:[#allocation3 + $0xb48] sm:$0xff] }
 0x122   :  { %1974 = vmatprep.subr.bf16.mxu1 %v1973_v43  ;;  %v475_v43 = vld [vmem:[#allocation3 + $0xa18] sm:$0xff]  ;;  %v1995_v46 = vpack.c.bf16 %v470_v40, %v466_v38  ;;  %v510_v36 = vld [vmem:[#allocation3 + $0xb30] sm:$0xff]  ;;  %v517_v38 = vld [vmem:[#allocation3 + $0xb68] sm:$0xff] }
 0x123   :  { %v519_v40 = vld [vmem:[#allocation3 + $0xb78] sm:$0xff] }
 0x124   :  { %1784 = vmatpush1.bf16.msra.mxu0 %v1783_v49  ;;  %v476_v49 = vld [vmem:[#allocation3 + $0xa20] sm:$0xff] }
 0x125   :  { %1976 = vmatpush1.bf16.msra.mxu1 %v1975_v50  ;;  %1786 = vmatprep.subr.bf16.mxu0 %v1785_v51  ;;  %v474_v50 = vld [vmem:[#allocation3 + $0xa10] sm:$0xff]  ;;  %v1997_v51 = vpack.c.bf16 %v479_v44, %v475_v43  ;;  %v1807_v57 = vpack.c.bf16 %v476_v49, %v472_v48  ;;  %v1825_v43 = vpack.c.bf16 %v517_v38, %v513_v37  ;;  %v512_v44 = vld [vmem:[#allocation3 + $0xb40] sm:$0xff]  ;;  %v521_v49 = vld [vmem:[#allocation3 + $0xb88] sm:$0xff] }
 0x126   :  { %1978 = vmatprep.subr.bf16.mxu1 %v1977_v55  ;;  %v483_v55 = vld [vmem:[#allocation3 + $0xa58] sm:$0xff]  ;;  %v1999_v58 = vpack.c.bf16 %v478_v52, %v474_v50  ;;  %v518_v48 = vld [vmem:[#allocation3 + $0xb70] sm:$0xff]  ;;  %v525_v50 = vld [vmem:[#allocation3 + $0xba8] sm:$0xff] }
 0x127   :  { %v527_v52 = vld [vmem:[#allocation3 + $0xbb8] sm:$0xff] }
 0x128   :  { %1788 = vmatpush1.bf16.msra.mxu0 %v1787_v61  ;;  %v484_v61 = vld [vmem:[#allocation3 + $0xa60] sm:$0xff] }
 0x129   :  { %1980 = vmatpush1.bf16.msra.mxu1 %v1979_v62  ;;  %1790 = vmatprep.subr.bf16.mxu0 %v1789_v63  ;;  %v482_v62 = vld [vmem:[#allocation3 + $0xa50] sm:$0xff]  ;;  %v2001_v63 = vpack.c.bf16 %v487_v56, %v483_v55  ;;  %v1811_v5 = vpack.c.bf16 %v484_v61, %v480_v60  ;;  %v1829_v55 = vpack.c.bf16 %v525_v50, %v521_v49  ;;  %v520_v56 = vld [vmem:[#allocation3 + $0xb80] sm:$0xff]  ;;  %v529_v61 = vld [vmem:[#allocation3 + $0xbc8] sm:$0xff] }
 0x12a   :  { %1982 = vmatprep.subr.bf16.mxu1 %v1981_v3  ;;  %v491_v3 = vld [vmem:[#allocation3 + $0xa98] sm:$0xff]  ;;  %v2003_v6 = vpack.c.bf16 %v486_v0, %v482_v62  ;;  %v526_v60 = vld [vmem:[#allocation3 + $0xbb0] sm:$0xff]  ;;  %v533_v62 = vld [vmem:[#allocation3 + $0xbe8] sm:$0xff] }
 0x12b   :  { %v535_v0 = vld [vmem:[#allocation3 + $0xbf8] sm:$0xff] }
 0x12c   :  { %1792 = vmatpush1.bf16.msra.mxu0 %v1791_v9  ;;  %v492_v9 = vld [vmem:[#allocation3 + $0xaa0] sm:$0xff] }
 0x12d   :  { %1984 = vmatpush1.bf16.msra.mxu1 %v1983_v10  ;;  %1794 = vmatprep.subr.bf16.mxu0 %v1793_v11  ;;  %v490_v10 = vld [vmem:[#allocation3 + $0xa90] sm:$0xff]  ;;  %v2005_v11 = vpack.c.bf16 %v495_v4, %v491_v3  ;;  %v1815_v17 = vpack.c.bf16 %v492_v9, %v488_v8  ;;  %v1833_v3 = vpack.c.bf16 %v533_v62, %v529_v61  ;;  %v528_v4 = vld [vmem:[#allocation3 + $0xbc0] sm:$0xff] }
 0x12e   :  { %1986 = vmatprep.subr.bf16.mxu1 %v1985_v15  ;;  %v499_v15 = vld [vmem:[#allocation3 + $0xad8] sm:$0xff]  ;;  %v2007_v18 = vpack.c.bf16 %v494_v12, %v490_v10  ;;  %v534_v8 = vld [vmem:[#allocation3 + $0xbf0] sm:$0xff] }
 0x12f   :  { %v989_v9 = vld [vmem:[#allocation8 + $0x8] sm:$0xff]  ;;  %v991_v10 = vld [vmem:[#allocation8 + $0x18] sm:$0xff] }
 0x130   :  { %1796 = vmatpush1.bf16.msra.mxu0 %v1795_v21  ;;  %v500_v21 = vld [vmem:[#allocation3 + $0xae0] sm:$0xff]  ;;  %v2029_v14 = vpack.c.bf16 %v991_v10, %v989_v9 }
 0x131   :  { %1988 = vmatpush1.bf16.msra.mxu1 %v1987_v22  ;;  %1798 = vmatprep.subr.bf16.mxu0 %v1797_v23  ;;  %v498_v22 = vld [vmem:[#allocation3 + $0xad0] sm:$0xff]  ;;  %v2009_v23 = vpack.c.bf16 %v503_v16, %v499_v15  ;;  %v1819_v29 = vpack.c.bf16 %v500_v21, %v496_v20  ;;  %v144_v12 = vld [vmem:[%s2746_s0 + $0x20] sm:$0xff] }
 0x132   :  { %1990 = vmatprep.subr.bf16.mxu1 %v1989_v27  ;;  %v507_v27 = vld [vmem:[#allocation3 + $0xb18] sm:$0xff]  ;;  %v2011_v30 = vpack.c.bf16 %v502_v24, %v498_v22  ;;  %v988_v15 = vld [vmem:[#allocation8] sm:$0xff]  ;;  %v997_v24 = vld [vmem:[#allocation8 + $0x48] sm:$0xff] }
 0x133   :  { %v990_v16 = vld [vmem:[#allocation8 + $0x10] sm:$0xff]  ;;  %v992_v22 = vld [vmem:[#allocation8 + $0x20] sm:$0xff]  ;;  %v999_v25 = vld [vmem:[#allocation8 + $0x58] sm:$0xff] }
 0x134   :  { %1800 = vmatpush1.bf16.msra.mxu0 %v1799_v33  ;;  %v508_v33 = vld [vmem:[#allocation3 + $0xb20] sm:$0xff]  ;;  %v2031_v20 = vpack.c.bf16 %v990_v16, %v988_v15 }
 0x135   :  { %1992 = vmatpush1.bf16.msra.mxu1 %v1991_v34  ;;  %1802 = vmatprep.subr.bf16.mxu0 %v1801_v35  ;;  %v506_v34 = vld [vmem:[#allocation3 + $0xb10] sm:$0xff]  ;;  %v2013_v35 = vpack.c.bf16 %v511_v28, %v507_v27  ;;  %v1823_v41 = vpack.c.bf16 %v508_v33, %v504_v32  ;;  %v2037_v27 = vpack.c.bf16 %v999_v25, %v997_v24  ;;  %v996_v28 = vld [vmem:[#allocation8 + $0x40] sm:$0xff]  ;;  %v1007_v37 = vld [vmem:[#allocation8 + $0x98] sm:$0xff] }
 0x136   :  { %1994 = vmatprep.subr.bf16.mxu1 %v1993_v39  ;;  %v515_v39 = vld [vmem:[#allocation3 + $0xb58] sm:$0xff]  ;;  %v2015_v42 = vpack.c.bf16 %v510_v36, %v506_v34  ;;  %v1000_v34 = vld [vmem:[#allocation8 + $0x60] sm:$0xff]  ;;  %v1005_v36 = vld [vmem:[#allocation8 + $0x88] sm:$0xff] }
 0x137   :  { %v1015_v49 = vld [vmem:[#allocation8 + $0xd8] sm:$0xff]  ;;  %v1036_v24 = vld [vmem:[#allocation8 + $0x180] sm:$0xff]  ;;  %v1038_v25 = vld [vmem:[#allocation8 + $0x190] sm:$0xff] }
 0x138   :  { %1804 = vmatpush1.bf16.msra.mxu0 %v1803_v45  ;;  %v516_v45 = vld [vmem:[#allocation3 + $0xb60] sm:$0xff] }
 0x139   :  { %1996 = vmatpush1.bf16.msra.mxu1 %v1995_v46  ;;  %1806 = vmatprep.subr.bf16.mxu0 %v1805_v47  ;;  %v514_v46 = vld [vmem:[#allocation3 + $0xb50] sm:$0xff]  ;;  %v2017_v47 = vpack.c.bf16 %v519_v40, %v515_v39  ;;  %v1827_v53 = vpack.c.bf16 %v516_v45, %v512_v44  ;;  %v2045_v39 = vpack.c.bf16 %v1007_v37, %v1005_v36  ;;  %v1004_v40 = vld [vmem:[#allocation8 + $0x80] sm:$0xff]  ;;  %v1023_v61 = vld [vmem:[#allocation8 + $0x118] sm:$0xff] }
 0x13a   :  { %1998 = vmatprep.subr.bf16.mxu1 %v1997_v51  ;;  %v523_v51 = vld [vmem:[#allocation3 + $0xb98] sm:$0xff]  ;;  %v2019_v54 = vpack.c.bf16 %v518_v48, %v514_v46  ;;  %v1008_v46 = vld [vmem:[#allocation8 + $0xa0] sm:$0xff]  ;;  %v1013_v48 = vld [vmem:[#allocation8 + $0xc8] sm:$0xff] }
 0x13b   :  { %v1031_v9 = vld [vmem:[#allocation8 + $0x158] sm:$0xff]  ;;  %v1044_v36 = vld [vmem:[#allocation8 + $0x1c0] sm:$0xff]  ;;  %v1046_v37 = vld [vmem:[#allocation8 + $0x1d0] sm:$0xff] }
 0x13c   :  { %1808 = vmatpush1.bf16.msra.mxu0 %v1807_v57  ;;  %v524_v57 = vld [vmem:[#allocation3 + $0xba0] sm:$0xff] }
 0x13d   :  { %2000 = vmatpush1.bf16.msra.mxu1 %v1999_v58  ;;  %1810 = vmatprep.subr.bf16.mxu0 %v1809_v59  ;;  %v522_v58 = vld [vmem:[#allocation3 + $0xb90] sm:$0xff]  ;;  %v2021_v59 = vpack.c.bf16 %v527_v52, %v523_v51  ;;  %v1831_v1 = vpack.c.bf16 %v524_v57, %v520_v56  ;;  %v2053_v51 = vpack.c.bf16 %v1015_v49, %v1013_v48  ;;  %v1012_v52 = vld [vmem:[#allocation8 + $0xc0] sm:$0xff]  ;;  %v1035_v15 = vld [vmem:[#allocation8 + $0x178] sm:$0xff] }
 0x13e   :  { %2002 = vmatprep.subr.bf16.mxu1 %v2001_v63  ;;  %v531_v63 = vld [vmem:[#allocation3 + $0xbd8] sm:$0xff]  ;;  %v2023_v2 = vpack.c.bf16 %v526_v60, %v522_v58  ;;  %v1016_v58 = vld [vmem:[#allocation8 + $0xe0] sm:$0xff]  ;;  %v1021_v60 = vld [vmem:[#allocation8 + $0x108] sm:$0xff] }
 0x13f   :  { %v1288_v48 = vld [vmem:[#allocation11 + $0x80] sm:$0xff]  ;;  %v1289_v49 = vld [vmem:[#allocation11 + $0x88] sm:$0xff] }
 0x140   :  { %1812 = vmatpush1.bf16.msra.mxu0 %v1811_v5  ;;  %v532_v5 = vld [vmem:[#allocation3 + $0xbe0] sm:$0xff] }
 0x141   :  { %2004 = vmatpush1.bf16.msra.mxu1 %v2003_v6  ;;  %1814 = vmatprep.subr.bf16.mxu0 %v1813_v7  ;;  %v530_v6 = vld [vmem:[#allocation3 + $0xbd0] sm:$0xff]  ;;  %v2025_v7 = vpack.c.bf16 %v535_v0, %v531_v63  ;;  %v2061_v63 = vpack.c.bf16 %v1023_v61, %v1021_v60  ;;  %v1020_v0 = vld [vmem:[#allocation8 + $0x100] sm:$0xff] }
 0x142   :  { %2006 = vmatprep.subr.bf16.mxu1 %v2005_v11  ;;  %v1835_v11 = vpack.c.bf16 %v532_v5, %v528_v4  ;;  %v2027_v13 = vpack.c.bf16 %v534_v8, %v530_v6  ;;  %v1024_v6 = vld [vmem:[#allocation8 + $0x120] sm:$0xff]  ;;  %v1029_v8 = vld [vmem:[#allocation8 + $0x148] sm:$0xff] }
 0x143   :  { %v1293_v60 = vld [vmem:[#allocation11 + $0xa8] sm:$0xff] }
 0x144   :  { %1816 = vmatpush1.bf16.msra.mxu0 %v1815_v17  ;;  %v993_v17 = vld [vmem:[#allocation8 + $0x28] sm:$0xff] }
 0x145   :  { %2008 = vmatpush1.bf16.msra.mxu1 %v2007_v18  ;;  %1818 = vmatprep.subr.bf16.mxu0 %v1817_v19  ;;  %v995_v18 = vld [vmem:[#allocation8 + $0x38] sm:$0xff]  ;;  %v1552_v19 = vadd.f32 -0.5, %v144_v12  ;;  %v1028_v12 = vld [vmem:[#allocation8 + $0x140] sm:$0xff] }
 0x146   :  { %2010 = vmatprep.subr.bf16.mxu1 %v2009_v23  ;;  %v2033_v21 = vpack.c.bf16 %v995_v18, %v993_v17  ;;  %v994_v23 = vld [vmem:[#allocation8 + $0x30] sm:$0xff]  ;;  %v1032_v18 = vld [vmem:[#allocation8 + $0x160] sm:$0xff] }
 0x147   :  { %v2035_v26 = vpack.c.bf16 %v994_v23, %v992_v22 }
 0x148   :  { %1820 = vmatpush1.bf16.msra.mxu0 %v1819_v29  ;;  %v998_v29 = vld [vmem:[#allocation8 + $0x50] sm:$0xff] }
 0x149   :  { %2012 = vmatpush1.bf16.msra.mxu1 %v2011_v30  ;;  %1822 = vmatprep.subr.bf16.mxu0 %v1821_v31  ;;  %v1001_v30 = vld [vmem:[#allocation8 + $0x68] sm:$0xff]  ;;  %v1003_v31 = vld [vmem:[#allocation8 + $0x78] sm:$0xff]  ;;  %v2039_v32 = vpack.c.bf16 %v998_v29, %v996_v28  ;;  %v2079_v28 = vpack.c.bf16 %v1038_v25, %v1036_v24 }
 0x14a   :  { %2014 = vmatprep.subr.bf16.mxu1 %v2013_v35  ;;  %v2041_v33 = vpack.c.bf16 %v1003_v31, %v1001_v30  ;;  %v1002_v35 = vld [vmem:[#allocation8 + $0x70] sm:$0xff]  ;;  %v1040_v30 = vld [vmem:[#allocation8 + $0x1a0] sm:$0xff] }
 0x14b   :  { %v2043_v38 = vpack.c.bf16 %v1002_v35, %v1000_v34  ;;  %v1042_v31 = vld [vmem:[#allocation8 + $0x1b0] sm:$0xff] }
 0x14c   :  { %1824 = vmatpush1.bf16.msra.mxu0 %v1823_v41  ;;  %v1006_v41 = vld [vmem:[#allocation8 + $0x90] sm:$0xff]  ;;  %v2083_v34 = vpack.c.bf16 %v1042_v31, %v1040_v30 }
 0x14d   :  { %2016 = vmatpush1.bf16.msra.mxu1 %v2015_v42  ;;  %1826 = vmatprep.subr.bf16.mxu0 %v1825_v43  ;;  %v1009_v42 = vld [vmem:[#allocation8 + $0xa8] sm:$0xff]  ;;  %v1011_v43 = vld [vmem:[#allocation8 + $0xb8] sm:$0xff]  ;;  %v2047_v44 = vpack.c.bf16 %v1006_v41, %v1004_v40 }
 0x14e   :  { %2018 = vmatprep.subr.bf16.mxu1 %v2017_v47  ;;  %v2049_v45 = vpack.c.bf16 %v1011_v43, %v1009_v42  ;;  %v1010_v47 = vld [vmem:[#allocation8 + $0xb0] sm:$0xff]  ;;  %v1051_v40 = vld [vmem:[#allocation8 + $0x1f8] sm:$0xff]  ;;  %v1048_v42 = vld [vmem:[#allocation8 + $0x1e0] sm:$0xff] }
 0x14f   :  { %v2051_v50 = vpack.c.bf16 %v1010_v47, %v1008_v46  ;;  %v1050_v43 = vld [vmem:[#allocation8 + $0x1f0] sm:$0xff]  ;;  %v1055_v46 = vld [vmem:[#allocation8 + $0x218] sm:$0xff] }
 0x150   :  { %1828 = vmatpush1.bf16.msra.mxu0 %v1827_v53  ;;  %v1014_v53 = vld [vmem:[#allocation8 + $0xd0] sm:$0xff] }
 0x151   :  { %2020 = vmatpush1.bf16.msra.mxu1 %v2019_v54  ;;  %1830 = vmatprep.subr.bf16.mxu0 %v1829_v55  ;;  %v1017_v54 = vld [vmem:[#allocation8 + $0xe8] sm:$0xff]  ;;  %v1019_v55 = vld [vmem:[#allocation8 + $0xf8] sm:$0xff]  ;;  %v2055_v56 = vpack.c.bf16 %v1014_v53, %v1012_v52 }
 0x152   :  { %2022 = vmatprep.subr.bf16.mxu1 %v2021_v59  ;;  %v2057_v57 = vpack.c.bf16 %v1019_v55, %v1017_v54  ;;  %v1018_v59 = vld [vmem:[#allocation8 + $0xf0] sm:$0xff]  ;;  %v1291_v54 = vld [vmem:[#allocation11 + $0x98] sm:$0xff] }
 0x153   :  { %v2059_v62 = vpack.c.bf16 %v1018_v59, %v1016_v58  ;;  %v1273_v52 = vld [vmem:[#allocation11 + $0x8] sm:$0xff]  ;;  %v1290_v53 = vld [vmem:[#allocation11 + $0x90] sm:$0xff]  ;;  %v1275_v58 = vld [vmem:[#allocation11 + $0x18] sm:$0xff] }
 0x154   :  { %1832 = vmatpush1.bf16.msra.mxu0 %v1831_v1  ;;  %v1022_v1 = vld [vmem:[#allocation8 + $0x110] sm:$0xff]  ;;  %v1292_v59 = vld [vmem:[#allocation11 + $0xa0] sm:$0xff] }
 0x155   :  { %2024 = vmatpush1.bf16.msra.mxu1 %v2023_v2  ;;  %1834 = vmatprep.subr.bf16.mxu0 %v1833_v3  ;;  %v1025_v2 = vld [vmem:[#allocation8 + $0x128] sm:$0xff]  ;;  %v1027_v3 = vld [vmem:[#allocation8 + $0x138] sm:$0xff]  ;;  %v2063_v4 = vpack.c.bf16 %v1022_v1, %v1020_v0 }
 0x156   :  { %2026 = vmatprep.subr.bf16.mxu1 %v2025_v7  ;;  %v2065_v5 = vpack.c.bf16 %v1027_v3, %v1025_v2  ;;  %v1026_v7 = vld [vmem:[#allocation8 + $0x130] sm:$0xff]  ;;  %v1295_v2 = vld [vmem:[#allocation11 + $0xb8] sm:$0xff] }
 0x157   :  { %v2067_v10 = vpack.c.bf16 %v1026_v7, %v1024_v6  ;;  %v1277_v0 = vld [vmem:[#allocation11 + $0x28] sm:$0xff]  ;;  %v1294_v1 = vld [vmem:[#allocation11 + $0xb0] sm:$0xff]  ;;  %v1279_v6 = vld [vmem:[#allocation11 + $0x38] sm:$0xff] }
 0x158   :  { %1836 = vmatpush1.bf16.msra.mxu0 %v1835_v11  ;;  %v2069_v11 = vpack.c.bf16 %v1031_v9, %v1029_v8  ;;  %v1296_v7 = vld [vmem:[#allocation11 + $0xc0] sm:$0xff]  ;;  %v1297_v8 = vld [vmem:[#allocation11 + $0xc8] sm:$0xff] }
 0x159   :  { %2028 = vmatpush1.bf16.msra.mxu1 %v2027_v13  ;;  %2030 = vmatprep.subr.bf16.mxu0 %v2029_v14  ;;  %v1030_v13 = vld [vmem:[#allocation8 + $0x150] sm:$0xff]  ;;  %v1033_v14 = vld [vmem:[#allocation8 + $0x168] sm:$0xff] }
 0x15a   :  { %v2071_v16 = vpack.c.bf16 %v1030_v13, %v1028_v12  ;;  %v2073_v17 = vpack.c.bf16 %v1035_v15, %v1033_v14  ;;  %v1281_v12 = vld [vmem:[#allocation11 + $0x48] sm:$0xff]  ;;  %v1298_v13 = vld [vmem:[#allocation11 + $0xd0] sm:$0xff]  ;;  %v1299_v14 = vld [vmem:[#allocation11 + $0xd8] sm:$0xff] }
 0x15b   :  { %765 = vmatmul.mubr.f32.vlgmr.msra.gmra.mrb[0].mxu0 %v1552_v19 }
 0x15c   :  { %978 = vmatmul.mubr.f32.vlgmr.msra.gmra.mrb[0].mxu1 %v1552_v19  ;;  %2032 = vmatpush1.bf16.msra.mxu0 %v2031_v20  ;;  %v1034_v19 = vld [vmem:[#allocation8 + $0x170] sm:$0xff]  ;;  %v1037_v20 = vld [vmem:[#allocation8 + $0x188] sm:$0xff] }
 0x15d   :  { %2034 = vmatprep.subr.bf16.mxu0 %v2033_v21  ;;  %v1039_v21 = vld [vmem:[#allocation8 + $0x198] sm:$0xff]  ;;  %v2075_v22 = vpack.c.bf16 %v1034_v19, %v1032_v18  ;;  %v1300_v19 = vld [vmem:[#allocation11 + $0xe0] sm:$0xff] }
 0x15e   :  { %v2077_v23 = vpack.c.bf16 %v1039_v21, %v1037_v20  ;;  %v1283_v18 = vld [vmem:[#allocation11 + $0x58] sm:$0xff]  ;;  %v1301_v20 = vld [vmem:[#allocation11 + $0xe8] sm:$0xff] }
 0x160   :  { %2036 = vmatpush1.bf16.msra.mxu0 %v2035_v26  ;;  %v1041_v26 = vld [vmem:[#allocation8 + $0x1a8] sm:$0xff] }
 0x161   :  { %2038 = vmatprep.subr.bf16.mxu0 %v2037_v27  ;;  %v1043_v27 = vld [vmem:[#allocation8 + $0x1b8] sm:$0xff] }
 0x162   :  { %v2081_v29 = vpack.c.bf16 %v1043_v27, %v1041_v26  ;;  %v2662_v26 = vld [vmem:[#allocation6] sm:$0xf] }
 0x164   :  { %2040 = vmatpush1.bf16.msra.mxu0 %v2039_v32  ;;  %v1045_v32 = vld [vmem:[#allocation8 + $0x1c8] sm:$0xff] }
 0x165   :  { %2042 = vmatprep.subr.bf16.mxu0 %v2041_v33  ;;  %v1047_v33 = vld [vmem:[#allocation8 + $0x1d8] sm:$0xff] }
 0x166   :  { %v2085_v35 = vpack.c.bf16 %v1047_v33, %v1045_v32 }
 0x168   :  { %2044 = vmatpush1.bf16.msra.mxu0 %v2043_v38  ;;  %v2087_v38 = vpack.c.bf16 %v1046_v37, %v1044_v36  ;;  %v1052_v36 = vld [vmem:[#allocation8 + $0x200] sm:$0xff]  ;;  %v1054_v37 = vld [vmem:[#allocation8 + $0x210] sm:$0xff] }
 0x169   :  { %2046 = vmatprep.subr.bf16.mxu0 %v2045_v39  ;;  %v1049_v39 = vld [vmem:[#allocation8 + $0x1e8] sm:$0xff] }
 0x16a   :  { %v2089_v41 = vpack.c.bf16 %v1051_v40, %v1049_v39  ;;  %v1057_v40 = vld [vmem:[#allocation8 + $0x228] sm:$0xff] }
 0x16c   :  { %2048 = vmatpush1.bf16.msra.mxu0 %v2047_v44  ;;  %v2091_v44 = vpack.c.bf16 %v1050_v43, %v1048_v42 }
 0x16d   :  { %2050 = vmatprep.subr.bf16.mxu0 %v2049_v45  ;;  %v1053_v45 = vld [vmem:[#allocation8 + $0x208] sm:$0xff] }
 0x16e   :  { %v2093_v47 = vpack.c.bf16 %v1055_v46, %v1053_v45 }
 0x170   :  { %2052 = vmatpush1.bf16.msra.mxu0 %v2051_v50  ;;  %v1272_v50 = vld [vmem:[#allocation11] sm:$0xff] }
 0x171   :  { %2054 = vmatprep.subr.bf16.mxu0 %v2053_v51  ;;  %v2157_v51 = vpack.c.bf16 %v1289_v49, %v1288_v48  ;;  %v2159_v55 = vpack.c.bf16 %v1273_v52, %v1272_v50  ;;  %v1058_v48 = vld [vmem:[#allocation8 + $0x230] sm:$0xff]  ;;  %v1061_v50 = vld [vmem:[#allocation8 + $0x248] sm:$0xff] }
 0x173   :  { %2158 = vmatprep.subr.bf16.mxu1 %v2157_v51  ;;  %v1063_v51 = vld [vmem:[#allocation8 + $0x258] sm:$0xff] }
 0x174   :  { %2056 = vmatpush1.bf16.msra.mxu0 %v2055_v56  ;;  %v2161_v56 = vpack.c.bf16 %v1291_v54, %v1290_v53  ;;  %2160 = vmatpush3.bf16.msra.mxu1 %v2159_v55  ;;  %v2101_v53 = vpack.c.bf16 %v1063_v51, %v1061_v50  ;;  %v1060_v54 = vld [vmem:[#allocation8 + $0x240] sm:$0xff]  ;;  %v1062_v55 = vld [vmem:[#allocation8 + $0x250] sm:$0xff]  ;;  %v1101_v51 = vld [vmem:[#allocation8 + $0x388] sm:$0xff] }
 0x175   :  { %2058 = vmatprep.subr.bf16.mxu0 %v2057_v57  ;;  %v1274_v57 = vld [vmem:[#allocation11 + $0x10] sm:$0xff] }
 0x176   :  { %v2163_v61 = vpack.c.bf16 %v1275_v58, %v1274_v57  ;;  %2162 = vmatprep.subr.bf16.mxu1 %v2161_v56  ;;  %v1065_v56 = vld [vmem:[#allocation8 + $0x268] sm:$0xff]  ;;  %v1067_v57 = vld [vmem:[#allocation8 + $0x278] sm:$0xff]  ;;  %v2103_v58 = vpack.c.bf16 %v1062_v55, %v1060_v54  ;;  %v1098_v50 = vld [vmem:[#allocation8 + $0x370] sm:$0xff] }
 0x177   :  { %v1100_v55 = vld [vmem:[#allocation8 + $0x380] sm:$0xff] }
 0x178   :  { %2060 = vmatpush1.bf16.msra.mxu0 %v2059_v62  ;;  %v2165_v62 = vpack.c.bf16 %v1293_v60, %v1292_v59  ;;  %2164 = vmatpush3.bf16.msra.mxu1 %v2163_v61  ;;  %v2105_v59 = vpack.c.bf16 %v1067_v57, %v1065_v56  ;;  %v1064_v60 = vld [vmem:[#allocation8 + $0x260] sm:$0xff]  ;;  %v1066_v61 = vld [vmem:[#allocation8 + $0x270] sm:$0xff]  ;;  %v1105_v57 = vld [vmem:[#allocation8 + $0x3a8] sm:$0xff] }
 0x179   :  { %2062 = vmatprep.subr.bf16.mxu0 %v2061_v63  ;;  %v1276_v63 = vld [vmem:[#allocation11 + $0x20] sm:$0xff]  ;;  %v1102_v56 = vld [vmem:[#allocation8 + $0x390] sm:$0xff] }
 0x17a   :  { %v2167_v3 = vpack.c.bf16 %v1277_v0, %v1276_v63  ;;  %2166 = vmatprep.subr.bf16.mxu1 %v2165_v62  ;;  %v1069_v62 = vld [vmem:[#allocation8 + $0x288] sm:$0xff]  ;;  %v1071_v63 = vld [vmem:[#allocation8 + $0x298] sm:$0xff]  ;;  %v2107_v0 = vpack.c.bf16 %v1066_v61, %v1064_v60  ;;  %v1104_v61 = vld [vmem:[#allocation8 + $0x3a0] sm:$0xff] }
 0x17c   :  { %2064 = vmatpush1.bf16.msra.mxu0 %v2063_v4  ;;  %v2169_v4 = vpack.c.bf16 %v1295_v2, %v1294_v1  ;;  %2168 = vmatpush3.bf16.msra.mxu1 %v2167_v3  ;;  %v2109_v1 = vpack.c.bf16 %v1071_v63, %v1069_v62  ;;  %v1068_v2 = vld [vmem:[#allocation8 + $0x280] sm:$0xff]  ;;  %v1070_v3 = vld [vmem:[#allocation8 + $0x290] sm:$0xff]  ;;  %v1109_v63 = vld [vmem:[#allocation8 + $0x3c8] sm:$0xff] }
 0x17d   :  { %2066 = vmatprep.subr.bf16.mxu0 %v2065_v5  ;;  %v1278_v5 = vld [vmem:[#allocation11 + $0x30] sm:$0xff] }
 0x17e   :  { %v2171_v9 = vpack.c.bf16 %v1279_v6, %v1278_v5  ;;  %2170 = vmatprep.subr.bf16.mxu1 %v2169_v4  ;;  %v1073_v4 = vld [vmem:[#allocation8 + $0x2a8] sm:$0xff]  ;;  %v1075_v5 = vld [vmem:[#allocation8 + $0x2b8] sm:$0xff]  ;;  %v2111_v6 = vpack.c.bf16 %v1070_v3, %v1068_v2  ;;  %v1106_v62 = vld [vmem:[#allocation8 + $0x3b0] sm:$0xff] }
 0x180   :  { %2068 = vmatpush1.bf16.msra.mxu0 %v2067_v10  ;;  %v2173_v10 = vpack.c.bf16 %v1297_v8, %v1296_v7  ;;  %2172 = vmatpush3.bf16.msra.mxu1 %v2171_v9  ;;  %v2113_v7 = vpack.c.bf16 %v1075_v5, %v1073_v4  ;;  %v1072_v8 = vld [vmem:[#allocation8 + $0x2a0] sm:$0xff]  ;;  %v1074_v9 = vld [vmem:[#allocation8 + $0x2b0] sm:$0xff] }
 0x181   :  { %2070 = vmatprep.subr.bf16.mxu0 %v2069_v11  ;;  %v1280_v11 = vld [vmem:[#allocation11 + $0x40] sm:$0xff]  ;;  %v1110_v5 = vld [vmem:[#allocation8 + $0x3d0] sm:$0xff] }
 0x182   :  { %v2175_v15 = vpack.c.bf16 %v1281_v12, %v1280_v11  ;;  %2174 = vmatprep.subr.bf16.mxu1 %v2173_v10  ;;  %v1077_v10 = vld [vmem:[#allocation8 + $0x2c8] sm:$0xff]  ;;  %v1079_v11 = vld [vmem:[#allocation8 + $0x2d8] sm:$0xff]  ;;  %v2115_v12 = vpack.c.bf16 %v1074_v9, %v1072_v8  ;;  %v1108_v4 = vld [vmem:[#allocation8 + $0x3c0] sm:$0xff] }
 0x183   :  { %v2151_v8 = vpack.c.bf16 %v1110_v5, %v1108_v4 }
 0x184   :  { %2072 = vmatpush1.bf16.msra.mxu0 %v2071_v16  ;;  %v2177_v16 = vpack.c.bf16 %v1299_v14, %v1298_v13  ;;  %2176 = vmatpush3.bf16.msra.mxu1 %v2175_v15  ;;  %v2117_v13 = vpack.c.bf16 %v1079_v11, %v1077_v10  ;;  %v1076_v14 = vld [vmem:[#allocation8 + $0x2c0] sm:$0xff]  ;;  %v1078_v15 = vld [vmem:[#allocation8 + $0x2d0] sm:$0xff] }
 0x185   :  { %2074 = vmatprep.subr.bf16.mxu0 %v2073_v17  ;;  %v1282_v17 = vld [vmem:[#allocation11 + $0x50] sm:$0xff]  ;;  %v1112_v11 = vld [vmem:[#allocation8 + $0x3e0] sm:$0xff] }
 0x186   :  { %v2179_v21 = vpack.c.bf16 %v1283_v18, %v1282_v17  ;;  %2178 = vmatprep.subr.bf16.mxu1 %v2177_v16  ;;  %v1081_v16 = vld [vmem:[#allocation8 + $0x2e8] sm:$0xff]  ;;  %v1083_v17 = vld [vmem:[#allocation8 + $0x2f8] sm:$0xff]  ;;  %v2119_v18 = vpack.c.bf16 %v1078_v15, %v1076_v14 }
 0x188   :  { %2076 = vmatpush1.bf16.msra.mxu0 %v2075_v22  ;;  %v2181_v22 = vpack.c.bf16 %v1301_v20, %v1300_v19  ;;  %2180 = vmatpush3.bf16.msra.mxu1 %v2179_v21  ;;  %v2121_v19 = vpack.c.bf16 %v1083_v17, %v1081_v16  ;;  %v1080_v20 = vld [vmem:[#allocation8 + $0x2e0] sm:$0xff]  ;;  %v1082_v21 = vld [vmem:[#allocation8 + $0x2f0] sm:$0xff] }
 0x189   :  { %2078 = vmatprep.subr.bf16.mxu0 %v2077_v23  ;;  %v538_v23 = vlaneseq  ;;  %v1284_v16 = vld [vmem:[#allocation11 + $0x60] sm:$0xff]  ;;  %v1285_v17 = vld [vmem:[#allocation11 + $0x68] sm:$0xff] }
 0x18a   :  { %2182 = vmatprep.subr.bf16.mxu1 %v2181_v22  ;;  %v1085_v22 = vld [vmem:[#allocation8 + $0x308] sm:$0xff] }
 0x18b   :  { %v2659_v24 = vshrl.u32 %v538_v23, 7  ;;  %v1087_v23 = vld [vmem:[#allocation8 + $0x318] sm:$0xff] }
 0x18c   :  { %2080 = vmatpush1.bf16.msra.mxu0 %v2079_v28 }
 0x18d   :  { %2082 = vmatprep.subr.bf16.mxu0 %v2081_v29  ;;  %v540_v25 = vsub.s32 0, %v2659_v24  ;;  %v544_v27 = vsub.s32 1, %v2659_v24  ;;  %v552_v28 = vsub.s32 3, %v2659_v24  ;;  %v548_v2 = vsub.s32 2, %v2659_v24 }
 0x18e   :  { %vm1502_vm3 = vcmp.lt.s32.totalorder %v2659_v24, 2 }
 0x18f   :  { %v541_v29 = vrot.slane %v2662_v26, %v540_v25  ;;  %v545_v30 = vrot.slane %v2662_v26, %v544_v27  ;;  %v553_v31 = vrot.slane %v2662_v26, %v552_v28  ;;  %v2123_v28 = vpack.c.bf16 %v1082_v21, %v1080_v20  ;;  %v1303_v20 = vld [vmem:[#allocation11 + $0xf8] sm:$0xff] }
 0x190   :  { %2084 = vmatpush1.bf16.msra.mxu0 %v2083_v34  ;;  %v549_v9 = vrot.slane %v2662_v26, %v548_v2  ;;  %v1286_v26 = vld [vmem:[#allocation11 + $0x70] sm:$0xff] }
 0x191   :  { %2086 = vmatprep.subr.bf16.mxu0 %v2085_v35 }
 0x194   :  { %2088 = vmatpush1.bf16.msra.mxu0 %v2087_v38 }
 0x195   :  { %2090 = vmatprep.subr.bf16.mxu0 %v2089_v41  ;;  %v1059_v41 = vld [vmem:[#allocation8 + $0x238] sm:$0xff] }
 0x196   :  { %v2097_v46 = vpack.c.bf16 %v1059_v41, %v1057_v40  ;;  %v1095_v40 = vld [vmem:[#allocation8 + $0x358] sm:$0xff] }
 0x198   :  { %2092 = vmatpush1.bf16.msra.mxu0 %v2091_v44  ;;  %v2095_v44 = vpack.c.bf16 %v1054_v37, %v1052_v36  ;;  %v1088_v37 = vld [vmem:[#allocation8 + $0x320] sm:$0xff] }
 0x199   :  { %2094 = vmatprep.subr.bf16.mxu0 %v2093_v47  ;;  %v1056_v47 = vld [vmem:[#allocation8 + $0x220] sm:$0xff] }
 0x19a   :  { %v2099_v52 = vpack.c.bf16 %v1058_v48, %v1056_v47 }
 0x22e   :  { %v766_v32 = vpop.f32.mrb[0].mxu0 }
 0x22f   :  { %v2213_v33 = vadd.f32 %v766_v32, %v541_v29  ;;  %v2673_v34 = vpop.f32.mrb[0].mxu1  ;;  %v768_v35 = vpop.f32.mrb[1].mxu0  ;;  %v2125_v29 = vpack.c.bf16 %v1087_v23, %v1085_v22  ;;  %v1089_v32 = vld [vmem:[#allocation8 + $0x328] sm:$0xff]  ;;  %v1287_v22 = vld [vmem:[#allocation11 + $0x78] sm:$0xff] }
 0x230   :  { %v2214_v38 = vadd.f32 %v768_v35, %v545_v30  ;;  %v981_v39 = vpop.f32.mrb[1].mxu1  ;;  %v1084_v30 = vld [vmem:[#allocation8 + $0x300] sm:$0xff]  ;;  %v2215_v14 = vadd.f32 %v2673_v34, %v549_v9  ;;  %v2187_v23 = vpack.c.bf16 %v1287_v22, %v1286_v26 }
 0x231   :  { %v2216_v42 = vadd.f32 %v981_v39, %v553_v31  ;;  %v984_v45 = vmax.f32 %v2213_v33, 0.0  ;;  %v1086_v31 = vld [vmem:[#allocation8 + $0x310] sm:$0xff]  ;;  %v1091_v33 = vld [vmem:[#allocation8 + $0x338] sm:$0xff]  ;;  %v1093_v39 = vld [vmem:[#allocation8 + $0x348] sm:$0xff] }
 0x232   :  { %v985_v43 = vmax.f32 %v2214_v38, 0.0  ;;  %v2127_v35 = vpack.c.bf16 %v1086_v31, %v1084_v30  ;;  %v2129_v36 = vpack.c.bf16 %v1091_v33, %v1089_v32  ;;  %v1090_v38 = vld [vmem:[#allocation8 + $0x330] sm:$0xff]  ;;  %v986_v15 = vmax.f32 %v2215_v14, 0.0 }
 0x233   :  { %v987_v49 = vmax.f32 %v2216_v42, 0.0  ;;  %v2131_v41 = vpack.c.bf16 %v1090_v38, %v1088_v37  ;;  %v2133_v42 = vpack.c.bf16 %v1095_v40, %v1093_v39 }
 0x234   :  { %1192 = vmatprep.mubr.f32.mxu0 %v985_v43  ;;  %v1092_v43 = vld [vmem:[#allocation8 + $0x340] sm:$0xff] }
 0x235   :  { %1193 = vmatmul.mubr.f32.vlgmr.msra.gmra.mrb[2].mxu0 %v984_v45  ;;  %v1097_v45 = vld [vmem:[#allocation8 + $0x368] sm:$0xff] }
 0x236   :  { %2096 = vmatpush1.bf16.msra.mxu0 %v2095_v44  ;;  %1263 = vmatprep.mubr.f32.mxu0 %v987_v49  ;;  %v1094_v44 = vld [vmem:[#allocation8 + $0x350] sm:$0xff]  ;;  %v1096_v49 = vld [vmem:[#allocation8 + $0x360] sm:$0xff] }
 0x237   :  { %2098 = vmatprep.subr.bf16.mxu0 %v2097_v46  ;;  %v1099_v46 = vld [vmem:[#allocation8 + $0x378] sm:$0xff]  ;;  %v2135_v47 = vpack.c.bf16 %v1094_v44, %v1092_v43  ;;  %v1387_v43 = vld [vmem:[%s2753_s7 + $0x28] sm:$0xff] }
 0x238   :  { %v2137_v48 = vpack.c.bf16 %v1099_v46, %v1097_v45  ;;  %v1388_v45 = vld [vmem:[%s2753_s7 + $0x30] sm:$0xff]  ;;  %v1389_v46 = vld [vmem:[%s2753_s7 + $0x38] sm:$0xff] }
 0x23a   :  { %2100 = vmatpush1.bf16.msra.mxu0 %v2099_v52  ;;  %v1103_v52 = vld [vmem:[#allocation8 + $0x398] sm:$0xff] }
 0x23b   :  { %2102 = vmatprep.subr.bf16.mxu0 %v2101_v53  ;;  %v2139_v53 = vpack.c.bf16 %v1098_v50, %v1096_v49  ;;  %v2141_v54 = vpack.c.bf16 %v1103_v52, %v1101_v51  ;;  %v1391_v49 = vld [vmem:[%s2753_s7 + $0x48] sm:$0xff]  ;;  %v1392_v51 = vld [vmem:[%s2753_s7 + $0x50] sm:$0xff]  ;;  %v1393_v52 = vld [vmem:[%s2753_s7 + $0x58] sm:$0xff] }
 0x23e   :  { %2104 = vmatpush1.bf16.msra.mxu0 %v2103_v58  ;;  %v1107_v58 = vld [vmem:[#allocation8 + $0x3b8] sm:$0xff] }
 0x23f   :  { %2106 = vmatprep.subr.bf16.mxu0 %v2105_v59  ;;  %v2143_v59 = vpack.c.bf16 %v1102_v56, %v1100_v55  ;;  %v2145_v60 = vpack.c.bf16 %v1107_v58, %v1105_v57  ;;  %v1395_v55 = vld [vmem:[%s2753_s7 + $0x68] sm:$0xff]  ;;  %v1396_v57 = vld [vmem:[%s2753_s7 + $0x70] sm:$0xff]  ;;  %v1397_v58 = vld [vmem:[%s2753_s7 + $0x78] sm:$0xff] }
 0x242   :  { %2108 = vmatpush1.bf16.msra.mxu0 %v2107_v0  ;;  %v1111_v0 = vld [vmem:[#allocation8 + $0x3d8] sm:$0xff] }
 0x243   :  { %2110 = vmatprep.subr.bf16.mxu0 %v2109_v1  ;;  %v2147_v1 = vpack.c.bf16 %v1106_v62, %v1104_v61  ;;  %v2149_v3 = vpack.c.bf16 %v1111_v0, %v1109_v63  ;;  %v1554_v62 = vld [vmem:[#allocation12] ss:$0 sm:$0xff] }
 0x246   :  { %2112 = vmatpush1.bf16.msra.mxu0 %v2111_v6  ;;  %v1113_v6 = vld [vmem:[#allocation8 + $0x3e8] sm:$0xff] }
 0x247   :  { %2114 = vmatprep.subr.bf16.mxu0 %v2113_v7  ;;  %v1115_v7 = vld [vmem:[#allocation8 + $0x3f8] sm:$0xff] }
 0x248   :  { %v2153_v10 = vpack.c.bf16 %v1115_v7, %v1113_v6  ;;  %v1556_v7 = vld [vmem:[#allocation15] ss:$0 sm:$0xff] }
 0x24a   :  { %2116 = vmatpush1.bf16.msra.mxu0 %v2115_v12  ;;  %v1114_v12 = vld [vmem:[#allocation8 + $0x3f0] sm:$0xff] }
 0x24b   :  { %2118 = vmatprep.subr.bf16.mxu0 %v2117_v13  ;;  %v2155_v13 = vpack.c.bf16 %v1114_v12, %v1112_v11  ;;  %v1557_v11 = vld [vmem:[#allocation2] ss:$0 sm:$0xff] }
 0x24e   :  { %2120 = vmatpush1.bf16.msra.mxu0 %v2119_v18  ;;  %v2183_v18 = vpack.c.bf16 %v1285_v17, %v1284_v16 }
 0x24f   :  { %2122 = vmatprep.subr.bf16.mxu0 %v2121_v19  ;;  %v1302_v19 = vld [vmem:[#allocation11 + $0xf0] sm:$0xff] }
 0x250   :  { %2184 = vmatpush3.bf16.msra.mxu1 %v2183_v18  ;;  %v2185_v21 = vpack.c.bf16 %v1303_v20, %v1302_v19 }
 0x252   :  { %2124 = vmatpush1.bf16.msra.mxu0 %v2123_v28  ;;  %2186 = vmatprep.subr.bf16.mxu1 %v2185_v21  ;;  %v2471_v28 = vmov 0.0|0.0  }
 0x253   :  { %2126 = vmatprep.subr.bf16.mxu0 %v2125_v29  ;;  %v1116_v29 = vld [vmem:[#allocation9] sm:$0x3] }
 0x254   :  { %2188 = vmatpush3.bf16.msra.mxu1 %v2187_v23  ;;  %v1121_v34 = vrot.slane %v1116_v29, %v540_v25  ;;  %v1125_v30 = vrot.slane %v1116_v29, %v544_v27  ;;  %v1384_v25 = vld [vmem:[%s2753_s7 + $0x10] sm:$0xff]  ;;  %v1385_v27 = vld [vmem:[%s2753_s7 + $0x18] sm:$0xff] }
 0x255   :  { %2189 = vmatprep.subr.bf16.mxu1 %v2471_v28 }
 0x256   :  { %2128 = vmatpush1.bf16.msra.mxu0 %v2127_v35  ;;  %v1382_v35 = vld [vmem:[%s2753_s7] sm:$0xff] }
 0x257   :  { %2130 = vmatprep.subr.bf16.mxu0 %v2129_v36  ;;  %v1383_v36 = vld [vmem:[%s2753_s7 + $0x8] sm:$0xff] }
 0x258   :  { %v2190_v39 = vpack.c.bf16 %v1383_v36, %v1382_v35 }
 0x25a   :  { %2132 = vmatpush1.bf16.msra.mxu0 %v2131_v41  ;;  %v2193_v41 = vpack.c.bf16 %v1385_v27, %v1384_v25 }
 0x25b   :  { %2134 = vmatprep.subr.bf16.mxu0 %v2133_v42  ;;  %v1386_v42 = vld [vmem:[%s2753_s7 + $0x20] sm:$0xff] }
 0x25c   :  { %v2196_v44 = vpack.c.bf16 %v1387_v43, %v1386_v42 }
 0x25e   :  { %2136 = vmatpush1.bf16.msra.mxu0 %v2135_v47  ;;  %v2199_v47 = vpack.c.bf16 %v1389_v46, %v1388_v45 }
 0x25f   :  { %2138 = vmatprep.subr.bf16.mxu0 %v2137_v48  ;;  %v1390_v48 = vld [vmem:[%s2753_s7 + $0x40] sm:$0xff] }
 0x260   :  { %v2202_v50 = vpack.c.bf16 %v1391_v49, %v1390_v48 }
 0x262   :  { %2140 = vmatpush1.bf16.msra.mxu0 %v2139_v53  ;;  %v2205_v53 = vpack.c.bf16 %v1393_v52, %v1392_v51 }
 0x263   :  { %2142 = vmatprep.subr.bf16.mxu0 %v2141_v54  ;;  %v1394_v54 = vld [vmem:[%s2753_s7 + $0x60] sm:$0xff]  ;;  %s2474_s7 = smov [#allocation17]  }
 0x264   :  { %v2208_v56 = vpack.c.bf16 %v1395_v55, %v1394_v54  ;;  %s1535_s18 = sshll.u32 %s2474_s7, 4  ;;  %s1536_s18 = int_to_ptr.vmem [resolvable:$true] %s1535_s18 }
 0x265   :  { %s2423_s19 = scalar_lea.vmem %s1536_s18, 16  ;;  %s2427_s21 = scalar_lea.vmem %s1536_s18, 32 }
 0x266   :  { %2144 = vmatpush1.bf16.msra.mxu0 %v2143_v59  ;;  %v2211_v59 = vpack.c.bf16 %v1397_v58, %v1396_v57  ;;  %p2424_p8 = scmp.ne.s32.totalorder %s1536_s18, %s2423_s19  ;;  %p2428_p9 = scmp.lt.s32.totalorder %s1536_s18, %s1536_s18 }
 0x267   :  { %2146 = vmatprep.subr.bf16.mxu0 %v2145_v60  ;;  %v2473_v60 = vmov 0.0   ;;  %p2429_p10 = scmp.lt.s32.totalorder %s2427_s21, %s2423_s19 }
 0x268   :  { %1518 = vst.msk [vmem:[#allocation17] sm:$0x1] %vm1517_vm0, %v2473_v60 }
 0x269   :  { %p2430_p11 = por %p2429_p10, %p2428_p9 }
 0x26a   :  { %2148 = vmatpush1.bf16.msra.mxu0 %v2147_v1 }
 0x26b   :  { %2150 = vmatprep.subr.bf16.mxu0 %v2149_v3  ;;  %v1555_v3 = vld [vmem:[#allocation14] ss:$0 sm:$0xff]  ;;  %p2431_p12 = pnand %p2430_p11, %p2424_p8 }
 0x26e   :  { %2152 = vmatpush1.bf16.msra.mxu0 %v2151_v8 }
 0x26f   :  { %2154 = vmatprep.subr.bf16.mxu0 %v2153_v10  ;;  %v1519_v26 = vld [vmem:[#allocation17] sm:$0x1] }
 0x272   :  { %2156 = vmatpush1.bf16.msra.mxu0 %v2155_v13 }
 0x275   :  { %1264 = vmatmul.mubr.f32.vlgmr.msra.gmra.mrb[2].mxu0 %v986_v15 }
 0x348   :  { %v1265_v31 = vpop.f32.mrb[2].mxu0 }
 0x349   :  { %v2217_v32 = vadd.f32 %v1265_v31, %v1121_v34  ;;  %v1267_v33 = vpop.f32.mrb[3].mxu0 }
 0x34a   :  { %v2218_v37 = vadd.f32 %v1267_v33, %v1125_v30 }
 0x34b   :  { %v1270_v40 = vmax.f32 %v2217_v32, 0.0 }
 0x34c   :  { %v1271_v38 = vmax.f32 %v2218_v37, 0.0 }
 0x34e   :  { %1375 = vmatprep.mubr.f32.mxu1 %v1271_v38 }
 0x34f   :  { %1376 = vmatmul.mubr.f32.vlgmr.msra.gmra.mrb[2].mxu1 %v1270_v40 }
 0x350   :  { %2191 = vmatpush3.bf16.msra.mxu1 %v2190_v39  ;;  %1642 = vmatprep.mubr.msk.f32.mxu1 %vm2472_vm1, %v2473_v60 }
 0x351   :  { %2192 = vmatprep.subr.bf16.mxu1 %v2471_v28 }
 0x354   :  { %2194 = vmatpush3.bf16.msra.mxu1 %v2193_v41 }
 0x355   :  { %2195 = vmatprep.subr.bf16.mxu1 %v2471_v28 }
 0x358   :  { %2197 = vmatpush3.bf16.msra.mxu1 %v2196_v44 }
 0x359   :  { %2198 = vmatprep.subr.bf16.mxu1 %v2471_v28 }
 0x35c   :  { %2200 = vmatpush3.bf16.msra.mxu1 %v2199_v47 }
 0x35d   :  { %2201 = vmatprep.subr.bf16.mxu1 %v2471_v28 }
 0x360   :  { %2203 = vmatpush3.bf16.msra.mxu1 %v2202_v50 }
 0x361   :  { %2204 = vmatprep.subr.bf16.mxu1 %v2471_v28 }
 0x364   :  { %2206 = vmatpush3.bf16.msra.mxu1 %v2205_v53 }
 0x365   :  { %2207 = vmatprep.subr.bf16.mxu1 %v2471_v28 }
 0x368   :  { %2209 = vmatpush3.bf16.msra.mxu1 %v2208_v56 }
 0x369   :  { %2210 = vmatprep.subr.bf16.mxu1 %v2471_v28 }
 0x36c   :  { %2212 = vmatpush3.bf16.msra.mxu1 %v2211_v59 }
 0x422   :  { %v1590_v61 = vpop.f32.mrb[2].mxu1 }
 0x423   :  { %v1591_v63 = vpop.f32.mrb[3].mxu1 }
 0x424   :  { %v1592_v0 = vadd.f32 %v1591_v63, %v1590_v61 }
 0x426   :  { %v1378_v1 = vadd.f32 %v1592_v0, %v1554_v62 }
 0x428   :  { %v1381_v2 = vmax.f32 %v1378_v1, 0.0 }
 0x42a   :  { %1643 = vmatmul.mubr.f32.vlgmr.msra.gmra.mrb[4].mxu1 %v1381_v2 }
 0x4fd   :  { %v1471_v4 = vpop.f32.mrb[4].mxu1 }
 0x4fe   :  { %v1472_v5 = vadd.f32 %v1555_v3, %v1471_v4  ;;  %v1644_v6 = vpop.f32.mrb[5].mxu1 }
 0x500   :  { %v1475_v8 = vmax.f32 %v1472_v5, 0.0 }
 0x502   :  { %v1483_v9 = vmul.f32 %v1556_v7, %v1475_v8 }
 0x504   :  { %v1485_v10 = vsel %vm1484_vm2, %v1483_v9, 0.0 }
 0x505   :  { %1486 = vadd.xlane.f32.xlu0 %v1485_v10 }
 0x592   :  { %v1487_v12 = vpop.xlane.xlu0 %1486 }
 0x593   :  { %v1495_v13 = vadd.f32 %v1557_v11, %v1487_v12 }
 0x595   :  { %v1496_v14 = vmax.f32 %v1495_v13, 0.0 }
 0x597   :  { %v1503_v15 = vsel %vm1502_vm3, %v1496_v14, 0.0 }
 0x598   :  { %v1506_v16 = vsel %vm1505_vm4, %v1503_v15, 0.0 }
 0x599   :  { %v1507_v17 = vrot.slane %v1506_v16, 4 }
 0x59b   :  { %v1508_v18 = vadd.f32 %v1507_v17, %v1506_v16 }
 0x59d   :  { %v1509_v19 = vrot.slane %v1508_v18, 2 }
 0x59f   :  { %v1510_v20 = vadd.f32 %v1509_v19, %v1508_v18 }
 0x5a1   :  { %v1511_v21 = vrot.slane %v1510_v20, 1 }
 0x5a3   :  { %v1512_v22 = vadd.f32 %v1511_v21, %v1510_v20 }
 0x5a5   :  { %v1520_v23 = vadd.f32 %v1519_v26, %v1512_v22 }
 0x5a7   :  { %1522 = vst.msk [vmem:[#allocation17] sm:$0x1] %vm1517_vm0, %v1520_v23 }
 0x5ae   :  { %v1526_v28 = vld [vmem:[#allocation17] sm:$0x1] }
 0x5af   :  { %v1527_v29 = vmul.f32 0.5, %v1526_v28 }
 0x5b1   :  { %1528 = vst.msk [vmem:[#allocation17] sm:$0x1] %vm1517_vm0, %v1527_v29 }
 0x5b2   :  { %2434 = shalt.err (!%p2431_p12)
}
 0x5b3   :  { %s2435_s23 = scalar_lea.hbm %s2757_s11, 16 }
 0x5b4   :  { %p2436_p13 = scmp.ne.s32.totalorder %s2757_s11, %s2435_s23  ;;  %p2439_p0 = scmp.lt.u32.totalorder %s2435_s23, %s2757_s11 }
 0x5b6   :  { %p2441_p1 = pnand %p2439_p0, %p2436_p13 }
 0x5b8   :  { %2444 = shalt.err (!%p2441_p1)
}
 0x5b9   :  { %1538 = dma.vmem_to_hbm [thread:$0]  %s1536_s18, 16, %s2757_s11, [#allocation5]  }
 0x5ba   :  { %2455 = dma.done.wait [#allocation5], 16  }
 0x5bb   :  { %2456 = vsyncadd [#allocation5], 4294967280 }
 0x5bc   :  { %1542 = vsyncpa [#allocation4], 1 }
 0x5bd   :  { %1543 = vsyncpa [#allocation7], 1 }
 0x5be   :  { %1544 = vsyncpa [#allocation10], 1 }
 0x5bf   :  { %1545 = vsyncpa [#allocation13], 1 }
 0x5c0   :  { %1546 = vsyncpa [#allocation16], 1 }
 0x5c1   :  { %1547 = vsyncpa [#allocation5], 1 }

</bundles_post_ra>
